<compile_context>
chip_gen: v6e
topology: v6e:2x2x1
jax: 0.10.0
libtpu: 0.0.40
codegen_flags: <defaults>
</compile_context>

<pallas_src>
import jax
import jax.numpy as jnp
from jax.experimental import pallas as pl
from jax.experimental.pallas import tpu as pltpu

_MAX_ONEHOT_ROWS = 4096  # guard for the one-hot gather path


def _round_up(x, m):
    return ((x + m - 1) // m) * m


def _mf_kernel(uidx_ref, ijidx_ref, uemb_ref, iemb_ref, out_ref):
    # uidx:  (1, Bc)    int32 user indices for this batch tile.
    # ijidx: (1, 2*Bc)  int32 item indices, [pos_item || neg_item].
    # uemb:  (Nu, D)    f32 user table (VMEM-resident, constant index_map).
    # iemb:  (Ni, D)    f32 item table (VMEM-resident, constant index_map).
    # out:   (1, 2*Bc)  f32 scores, [pos_score || neg_score] (lane-dense).
    uemb = uemb_ref[...]
    iemb = iemb_ref[...]
    uidx = uidx_ref[...]
    ijidx = ijidx_ref[...]

    nu = uemb.shape[0]
    ni = iemb.shape[0]
    bc = uidx.shape[-1]

    def onehot_gather_t(table, idx2d, nrows):
        # One-hot gather on the MXU, producing the gathered rows TRANSPOSED
        # to (D, ncols) so the score reduction is a sublane reduce whose
        # (1, ncols) result is lane-dense.  precision=HIGHEST keeps the f32
        # matmul exact on bf16-pass MXUs (out-of-range indices yield 0 rows).
        ncols = idx2d.shape[-1]
        rows = jax.lax.broadcasted_iota(jnp.int32, (nrows, ncols), 0)
        onehot = (rows == idx2d).astype(table.dtype)        # (nrows, ncols)
        return jax.lax.dot_general(
            table, onehot,
            dimension_numbers=(((0,), (0,)), ((), ())),      # contract rows
            preferred_element_type=jnp.float32,
            precision=jax.lax.Precision.HIGHEST)             # (D, ncols)

    u_t = onehot_gather_t(uemb, uidx, nu)      # (D, Bc)
    ij_t = onehot_gather_t(iemb, ijidx, ni)    # (D, 2*Bc) fused pos||neg

    # Sublane reduce over D; both halves land in one lane-dense output block.
    out_ref[:, :bc] = jnp.sum(u_t * ij_t[:, :bc], axis=0, keepdims=True)
    out_ref[:, bc:] = jnp.sum(u_t * ij_t[:, bc:], axis=0, keepdims=True)


def mf_self_forward(user_emb, item_emb, user, pos_item, neg_item, tile_b=512):
    """Equivalent of MF_self.forward for a mini-batch of index vectors.

    Returns (pos_score, neg_score), each (B, 1) float32.
    """
    B = user.shape[0]
    Nu, D = user_emb.shape
    Ni, Di = item_emb.shape
    assert D == Di

    if Nu > _MAX_ONEHOT_ROWS or Ni > _MAX_ONEHOT_ROWS:
        # TODO(synk): streamed / scalar-prefetch DMA gather path for large
        # embedding tables (one-hot cost is O(Nrows) and table must fit VMEM).
        raise NotImplementedError(
            "one-hot MXU gather path requires tables with <= "
            f"{_MAX_ONEHOT_ROWS} rows")

    # Batch-tile width: lane-aligned, <= tile_b, but no bigger than the padded
    # batch (keeps tiny batches cheap while real batches fill the MXU).
    bc = min(_round_up(tile_b, 128), _round_up(max(B, 1), 128))
    num_tiles = pl.cdiv(B, bc)
    Bp = num_tiles * bc
    pad = Bp - B

    def prep(idx):
        idx = idx.astype(jnp.int32)
        if pad:
            idx = jnp.pad(idx, (0, pad))   # pad with index 0 (a valid row)
        return idx.reshape(num_tiles, 1, bc)

    uidx = prep(user)
    pidx = prep(pos_item)
    nidx = prep(neg_item)
    ijidx = jnp.concatenate([pidx, nidx], axis=-1)   # (num_tiles, 1, 2*bc)

    uidx_spec = pl.BlockSpec((None, 1, bc), lambda t: (t, 0, 0))
    ijidx_spec = pl.BlockSpec((None, 1, 2 * bc), lambda t: (t, 0, 0))
    uemb_spec = pl.BlockSpec((Nu, D), lambda t: (0, 0))   # VMEM-resident table
    iemb_spec = pl.BlockSpec((Ni, D), lambda t: (0, 0))   # VMEM-resident table
    out_spec = pl.BlockSpec((None, 1, 2 * bc), lambda t: (t, 0, 0))

    # Explicit scoped-VMEM budget: tables (double-buffered by the pipeline),
    # one-hots, gather slabs, and double-buffered idx/out blocks + headroom.
    dt = 4
    est = (2 * (Nu + Ni) * D * dt            # tables
           + (Nu * bc + Ni * 2 * bc) * dt    # one-hots
           + 3 * D * bc * dt                 # gathered (D, Bc)+(D, 2Bc) slabs
           + 2 * (bc + 2 * bc + 2 * bc) * dt)  # idx/out blocks, double-buffered
    vmem_limit = int(min(max(2 * est, 16 * 1024 * 1024), 48 * 1024 * 1024))

    scores = pl.pallas_call(
        _mf_kernel,
        grid=(num_tiles,),
        in_specs=[uidx_spec, ijidx_spec, uemb_spec, iemb_spec],
        out_specs=out_spec,
        out_shape=jax.ShapeDtypeStruct((num_tiles, 1, 2 * bc), jnp.float32),
        compiler_params=pltpu.CompilerParams(
            dimension_semantics=("parallel",),
            vmem_limit_bytes=vmem_limit),
    )(uidx, ijidx, user_emb, item_emb)

    scores = scores.reshape(num_tiles, 2 * bc)
    pos = scores[:, :bc].reshape(Bp, 1)[:B]
    neg = scores[:, bc:].reshape(Bp, 1)[:B]
    return pos, neg


if __name__ == "__main__":
    num_users, num_items, embedding_dim = 32, 64, 128
    batch = 8

    key = jax.random.PRNGKey(0)
    k_u, k_i, k_uid, k_pid, k_nid = jax.random.split(key, 5)

    # Deterministic synthetic parameters (PyTorch nn.Embedding init ~ N(0, 1)).
    user_emb = jax.random.normal(k_u, (num_users, embedding_dim), dtype=jnp.float32)
    item_emb = jax.random.normal(k_i, (num_items, embedding_dim), dtype=jnp.float32)

    # mini_batch = {'user': ..., 'pos_item': ..., 'neg_item': ...}
    user = jax.random.randint(k_uid, (batch,), 0, num_users, dtype=jnp.int32)
    pos_item = jax.random.randint(k_pid, (batch,), 0, num_items, dtype=jnp.int32)
    neg_item = jax.random.randint(k_nid, (batch,), 0, num_items, dtype=jnp.int32)

    pos_score, neg_score = mf_self_forward(user_emb, item_emb, user, pos_item, neg_item)
    jax.block_until_ready((pos_score, neg_score))

    # Pure-JAX reference check.
    u = user_emb[user]
    i = item_emb[pos_item]
    j = item_emb[neg_item]
    pos_ref = jnp.sum(u * i, axis=1, keepdims=True)
    neg_ref = jnp.sum(u * j, axis=1, keepdims=True)
    assert pos_score.shape == (batch, 1) and neg_score.shape == (batch, 1)
    assert jnp.allclose(pos_score, pos_ref, atol=1e-5, rtol=1e-5)
    assert jnp.allclose(neg_score, neg_ref, atol=1e-5, rtol=1e-5)

    print("KERNEL_OK")
</pallas_src>

<mosaic_0001>
module attributes {stable_mosaic.version = 11 : i64} {
  func.func @_mf_kernel(%arg0: i32, %arg1: memref<1x1x128xi32, #tpu.memory_space<vmem>>, %arg2: memref<1x1x256xi32, #tpu.memory_space<vmem>>, %arg3: memref<32x128xf32, #tpu.memory_space<vmem>>, %arg4: memref<64x128xf32, #tpu.memory_space<vmem>>, %arg5: memref<1x1x256xf32, #tpu.memory_space<vmem>>) attributes {dimension_semantics = [#tpu.dimension_semantics<parallel>], iteration_bounds = array<i64: 1>, scalar_prefetch = 0 : i64, scratch_operands = 0 : i64, tpu.core_type = #tpu.core_type<tc>, window_params = [{transform_indices = @transform_0, window_bounds = array<i64: 1, 1, 128>}, {transform_indices = @transform_1, window_bounds = array<i64: 1, 1, 256>}, {pipeline_mode = #tpu.pipeline_mode<synchronous>, transform_indices = @transform_2, window_bounds = array<i64: 32, 128>}, {pipeline_mode = #tpu.pipeline_mode<synchronous>, transform_indices = @transform_3, window_bounds = array<i64: 64, 128>}, {transform_indices = @transform_4, window_bounds = array<i64: 1, 1, 256>}]} {
    %c0 = arith.constant 0 : index
    %c0_0 = arith.constant 0 : index
    %0 = vector.load %arg3[%c0, %c0_0] : memref<32x128xf32, #tpu.memory_space<vmem>>, vector<32x128xf32>
    %c0_1 = arith.constant 0 : index
    %c0_2 = arith.constant 0 : index
    %1 = vector.load %arg4[%c0_1, %c0_2] : memref<64x128xf32, #tpu.memory_space<vmem>>, vector<64x128xf32>
    %c0_3 = arith.constant 0 : index
    %c0_4 = arith.constant 0 : index
    %c0_5 = arith.constant 0 : index
    %2 = vector.load %arg1[%c0_3, %c0_4, %c0_5] : memref<1x1x128xi32, #tpu.memory_space<vmem>>, vector<1x1x128xi32>
    %3 = vector.shape_cast %2 : vector<1x1x128xi32> to vector<1x128xi32>
    %c0_6 = arith.constant 0 : index
    %c0_7 = arith.constant 0 : index
    %c0_8 = arith.constant 0 : index
    %4 = vector.load %arg2[%c0_6, %c0_7, %c0_8] : memref<1x1x256xi32, #tpu.memory_space<vmem>>, vector<1x1x256xi32>
    %5 = vector.shape_cast %4 : vector<1x1x256xi32> to vector<1x256xi32>
    %6 = tpu.iota {dimensions = array<i32: 0>} : vector<32x128xi32>
    %7 = vector.broadcast %3 : vector<1x128xi32> to vector<32x128xi32>
    %8 = arith.cmpi eq, %6, %7 : vector<32x128xi32>
    %9 = arith.extui %8 : vector<32x128xi1> to vector<32x128xi32>
    %10 = arith.sitofp %9 : vector<32x128xi32> to vector<32x128xf32>
    %cst = arith.constant dense<0.000000e+00> : vector<128x128xf32>
    %11 = tpu.matmul %0, %10, %cst {dimension_numbers = #tpu.dot_dimension_numbers<[0], [0], [1], [1], [0, 1, 1, 1], [], []>, precision = #tpu.contract_precision<fp32>} : vector<32x128xf32>, vector<32x128xf32>, vector<128x128xf32> -> vector<128x128xf32>
    %12 = tpu.iota {dimensions = array<i32: 0>} : vector<64x256xi32>
    %13 = vector.broadcast %5 : vector<1x256xi32> to vector<64x256xi32>
    %14 = arith.cmpi eq, %12, %13 : vector<64x256xi32>
    %15 = arith.extui %14 : vector<64x256xi1> to vector<64x256xi32>
    %16 = arith.sitofp %15 : vector<64x256xi32> to vector<64x256xf32>
    %cst_9 = arith.constant dense<0.000000e+00> : vector<128x256xf32>
    %17 = tpu.matmul %1, %16, %cst_9 {dimension_numbers = #tpu.dot_dimension_numbers<[0], [0], [1], [1], [0, 1, 1, 1], [], []>, precision = #tpu.contract_precision<fp32>} : vector<64x128xf32>, vector<64x256xf32>, vector<128x256xf32> -> vector<128x256xf32>
    %18 = vector.extract_strided_slice %17 {offsets = [0, 0], sizes = [128, 128], strides = [1, 1]} : vector<128x256xf32> to vector<128x128xf32>
    %19 = arith.mulf %11, %18 : vector<128x128xf32>
    %cst_10 = arith.constant dense<0.000000e+00> : vector<128xf32>
    %20 = vector.multi_reduction <add>, %19, %cst_10 [0] : vector<128x128xf32> to vector<128xf32>
    %21 = vector.shape_cast %20 : vector<128xf32> to vector<1x128xf32>
    %c0_11 = arith.constant 0 : index
    %c0_12 = arith.constant 0 : index
    %c0_13 = arith.constant 0 : index
    %22 = vector.load %arg5[%c0_11, %c0_12, %c0_13] : memref<1x1x256xf32, #tpu.memory_space<vmem>>, vector<1x1x128xf32>
    %23 = vector.shape_cast %22 : vector<1x1x128xf32> to vector<1x128xf32>
    %24 = vector.shape_cast %21 : vector<1x128xf32> to vector<1x1x128xf32>
    tpu.vector_store %arg5[%c0_11, %c0_12, %c0_13], %24 {strides = array<i32>} : memref<1x1x256xf32, #tpu.memory_space<vmem>>, vector<1x1x128xf32>,
    %25 = vector.extract_strided_slice %17 {offsets = [0, 128], sizes = [128, 128], strides = [1, 1]} : vector<128x256xf32> to vector<128x128xf32>
    %26 = arith.mulf %11, %25 : vector<128x128xf32>
    %cst_14 = arith.constant dense<0.000000e+00> : vector<128xf32>
    %27 = vector.multi_reduction <add>, %26, %cst_14 [0] : vector<128x128xf32> to vector<128xf32>
    %28 = vector.shape_cast %27 : vector<128xf32> to vector<1x128xf32>
    %c0_15 = arith.constant 0 : index
    %c0_16 = arith.constant 0 : index
    %c128 = arith.constant 128 : index
    %29 = vector.load %arg5[%c0_15, %c0_16, %c128] : memref<1x1x256xf32, #tpu.memory_space<vmem>>, vector<1x1x128xf32>
    %30 = vector.shape_cast %29 : vector<1x1x128xf32> to vector<1x128xf32>
    %31 = vector.shape_cast %28 : vector<1x128xf32> to vector<1x1x128xf32>
    tpu.vector_store %arg5[%c0_15, %c0_16, %c128], %31 {strides = array<i32>} : memref<1x1x256xf32, #tpu.memory_space<vmem>>, vector<1x1x128xf32>,
    return
  }
  func.func @transform_0(%arg0: i32) -> (i32, i32, i32) {
    %c0_i32 = arith.constant 0 : i32
    %c0_i32_0 = arith.constant 0 : i32
    %c0_i32_1 = arith.constant 0 : i32
    return %arg0, %c0_i32, %c0_i32_0 : i32, i32, i32
  }
  func.func @transform_1(%arg0: i32) -> (i32, i32, i32) {
    %c0_i32 = arith.constant 0 : i32
    %c0_i32_0 = arith.constant 0 : i32
    %c0_i32_1 = arith.constant 0 : i32
    return %arg0, %c0_i32, %c0_i32_0 : i32, i32, i32
  }
  func.func @transform_2(%arg0: i32) -> (i32, i32) {
    %c0_i32 = arith.constant 0 : i32
    %c0_i32_0 = arith.constant 0 : i32
    %c0_i32_1 = arith.constant 0 : i32
    return %c0_i32, %c0_i32_0 : i32, i32
  }
  func.func @transform_3(%arg0: i32) -> (i32, i32) {
    %c0_i32 = arith.constant 0 : i32
    %c0_i32_0 = arith.constant 0 : i32
    %c0_i32_1 = arith.constant 0 : i32
    return %c0_i32, %c0_i32_0 : i32, i32
  }
  func.func @transform_4(%arg0: i32) -> (i32, i32, i32) {
    %c0_i32 = arith.constant 0 : i32
    %c0_i32_0 = arith.constant 0 : i32
    %c0_i32_1 = arith.constant 0 : i32
    return %arg0, %c0_i32, %c0_i32_0 : i32, i32, i32
  }
}

</mosaic_0001>

<bundles_post_ra>
// kernel: tpu_custom_call.1
= control target key start
LH: loop header
LB: loop body
LE: loop exit
PB: predicated region body
PF: predicated region fallthrough
CT: control target
= control target key end

     0   :  { %9 = vsyncpa [#allocation3], 0  ;;  %s5098_s0 = inlined_call_operand.hbm [shape: s32[1,1,128], index: 0, kind: input, shape index: {}]   ;;  %s5099_s1 = inlined_call_operand.hbm [shape: s32[1,1,256], index: 1, kind: input, shape index: {}]   ;;  %s5100_s2 = inlined_call_operand.hbm [shape: f32[32,128], index: 2, kind: input, shape index: {}]   ;;  %s5101_s3 = inlined_call_operand.hbm [shape: f32[64,128], index: 3, kind: input, shape index: {}]   ;;  %s5102_s4 = inlined_call_operand.hbm [shape: f32[1,1,256], index: 4, kind: output, shape index: {}]  }
   0x1   :  { %10 = vsyncpa [#allocation6], 0 }
   0x2   :  { %11 = vsyncpa [#allocation9], 0 }
   0x3   :  { %12 = vsyncpa [#allocation4], 0  ;;  %s3445_s15 = smov [#allocation5]   ;;  %s3446_s17 = smov [#allocation2]  }
   0x4   :  { %s29_s16 = sshll.u32 %s3445_s15, 4  ;;  %s19_s18 = sshll.u32 %s3446_s17, 4  ;;  %s30_s16 = int_to_ptr.vmem [resolvable:$true] %s29_s16  ;;  %s20_s18 = int_to_ptr.vmem [resolvable:$true] %s19_s18 }
   0x5   :  { %s3345_s19 = scalar_lea.vmem %s30_s16, 32  ;;  %p3350_p1 = scmp.lt.s32.totalorder %s30_s16, %s30_s16 }
   0x6   :  { %p3346_p0 = scmp.ne.s32.totalorder %s30_s16, %s3345_s19  ;;  %p3351_p2 = scmp.lt.s32.totalorder %s3345_s19, %s3345_s19 }
   0x8   :  { %p3352_p3 = por %p3351_p2, %p3350_p1 }
   0xa   :  { %p3353_p4 = pnand %p3352_p3, %p3346_p0 }
   0xc   :  { %3356 = shalt.err (!%p3353_p4)
}
   0xd   :  { %32 = dma.hbm_to_vmem [thread:$0]  %s5099_s1, 32, %s30_s16, [#allocation6]  }
   0xe   :  { %s3365_s22 = scalar_lea.vmem %s20_s18, 16  ;;  %s3369_s23 = scalar_lea.vmem %s20_s18, 32 }
   0xf   :  { %p3366_p5 = scmp.ne.s32.totalorder %s20_s18, %s3365_s22  ;;  %p3370_p6 = scmp.lt.s32.totalorder %s20_s18, %s20_s18 }
  0x10   :  { %p3371_p7 = scmp.lt.s32.totalorder %s3369_s23, %s3365_s22 }
  0x12   :  { %p3372_p8 = por %p3371_p7, %p3370_p6 }
  0x14   :  { %p3373_p9 = pnand %p3372_p8, %p3366_p5 }
  0x16   :  { %3376 = shalt.err (!%p3373_p9)
}
  0x17   :  { %22 = dma.hbm_to_vmem [thread:$0]  %s5098_s0, 16, %s20_s18, [#allocation3]  }
  0x18   :  { %s3447_s26 = smov [#allocation7]  }
  0x19   :  { %s38_s27 = sshll.u32 %s3447_s26, 4  ;;  %s39_s27 = int_to_ptr.vmem [resolvable:$true] %s38_s27 }
  0x1a   :  { %s3385_s28 = scalar_lea.vmem %s39_s27, 512  ;;  %p3390_p11 = scmp.lt.s32.totalorder %s39_s27, %s39_s27 }
  0x1b   :  { %p3386_p10 = scmp.ne.s32.totalorder %s39_s27, %s3385_s28  ;;  %p3391_p12 = scmp.lt.s32.totalorder %s3385_s28, %s3385_s28 }
  0x1d   :  { %p3392_p13 = por %p3391_p12, %p3390_p11 }
  0x1f   :  { %p3393_p0 = pnand %p3392_p13, %p3386_p10 }
  0x21   :  { %3396 = shalt.err (!%p3393_p0)
}
  0x22   :  { %s3448_s1 = smov 128   ;;  %s3449_s29 = smov 8  }
  0x23   :  { %44 = dma.hbm_to_vmem [thread:$0]  %s5100_s2, 512, %s39_s27, [#allocation6], %s3448_s1, %s3448_s1, %s3449_s29  }
  0x24   :  { %s3450_s6 = smov [#allocation8]  }
  0x25   :  { %s50_s7 = sshll.u32 %s3450_s6, 4  ;;  %s51_s7 = int_to_ptr.vmem [resolvable:$true] %s50_s7 }
  0x26   :  { %s3405_s0 = scalar_lea.vmem %s51_s7, 1024  ;;  %p3410_p2 = scmp.lt.s32.totalorder %s51_s7, %s51_s7 }
  0x27   :  { %p3406_p1 = scmp.ne.s32.totalorder %s51_s7, %s3405_s0  ;;  %p3411_p3 = scmp.lt.s32.totalorder %s3405_s0, %s3405_s0 }
  0x29   :  { %p3412_p4 = por %p3411_p3, %p3410_p2 }
  0x2b   :  { %p3413_p5 = pnand %p3412_p4, %p3406_p1 }
  0x2d   :  { %3416 = shalt.err (!%p3413_p5)
}
  0x2e   :  { %56 = dma.hbm_to_vmem [thread:$0]  %s5101_s3, 1024, %s51_s7, [#allocation9], %s3448_s1, %s3448_s1, %s3449_s29  }
  0x2f   :  { %3437 = dma.done.wait [#allocation3], 16  }
  0x30   :  { %3438 = vsyncadd [#allocation3], 4294967280 }
  0x31   :  { %3439 = dma.done.wait [#allocation6], 544  }
  0x32   :  { %3440 = vsyncadd [#allocation6], 4294966752 }
  0x33   :  { %3441 = dma.done.wait [#allocation9], 1024  }
  0x34   :  { %3442 = vsyncadd [#allocation9], 4294966272  ;;  %v5103_v0 = vlaneseq  ;;  %v69_v5 = vld [vmem:[#allocation7] sm:$0xff]  ;;  %v2935_v6 = vld [vmem:[#allocation2] ss:$0 sm:$0xff]  ;;  %v3451_v13 = vmov 0.0  }
  0x35   :  { %104 = vxpose.xlu0.b32.start [1/4] (short) %v69_v5, 128  ;;  %v73_v7 = vld [vmem:[#allocation8] sm:$0xff]  ;;  %v70_v8 = vld [vmem:[#allocation7 + $0x8] sm:$0xff]  ;;  %v71_v23 = vld [vmem:[#allocation7 + $0x10] sm:$0xff]  ;;  %v5137_v28 = vmov 1.0   ;;  %vm136_vm4 = vcmask 261120   ;;  %s3453_s2 = smov [#allocation10]  }
  0x36   :  { %v3492_v1 = vshrl.u32 %v5103_v0, 7  ;;  %1375 = vxpose.xlu1.b32.start [1/8] (short) %v73_v7, 128  ;;  %v74_v17 = vld [vmem:[#allocation8 + $0x8] sm:$0xff]  ;;  %v75_v29 = vld [vmem:[#allocation8 + $0x10] sm:$0xff]  ;;  %v72_v33 = vld [vmem:[#allocation7 + $0x18] sm:$0xff]  ;;  %s2924_s3 = sshll.u32 %s3453_s2, 4  ;;  %s2925_s3 = int_to_ptr.vmem [resolvable:$true] %s2924_s3 }
  0x37   :  { %v76_v37 = vld [vmem:[#allocation8 + $0x18] sm:$0xff]  ;;  %v77_v40 = vld [vmem:[#allocation8 + $0x20] sm:$0xff]  ;;  %v78_v41 = vld [vmem:[#allocation8 + $0x28] sm:$0xff]  ;;  %s3417_s10 = scalar_lea.vmem %s2925_s3, 32  ;;  %p3422_p7 = scmp.lt.s32.totalorder %s2925_s3, %s2925_s3 }
  0x38   :  { %v3495_v2 = vadd.s32 24, %v3492_v1  ;;  %v3498_v3 = vadd.s32 16, %v3492_v1  ;;  %v3501_v4 = vadd.s32 8, %v3492_v1  ;;  %vm3519_vm3 = vcmp.eq.s32.totalorder %v3492_v1, %v2935_v6  ;;  %v79_v42 = vld [vmem:[#allocation8 + $0x30] sm:$0xff]  ;;  %v80_v43 = vld [vmem:[#allocation8 + $0x38] sm:$0xff]  ;;  %p3418_p6 = scmp.ne.s32.totalorder %s2925_s3, %s3417_s10  ;;  %p3423_p8 = scmp.lt.s32.totalorder %s3417_s10, %s3417_s10 }
  0x39   :  { %v2936_v18 = vsel %vm3519_vm3, 1.0, %v3451_v13  ;;  %105 = vxpose.xlu0.b32.cont [2/4] (short) %v70_v8, 128  ;;  %v3776_v0 = vadd.s32 56, %v3492_v1 }
  0x3a   :  { %vm3504_vm0 = vcmp.eq.s32.totalorder %v3495_v2, %v2935_v6  ;;  %vm3509_vm1 = vcmp.eq.s32.totalorder %v3498_v3, %v2935_v6  ;;  %vm3514_vm2 = vcmp.eq.s32.totalorder %v3501_v4, %v2935_v6  ;;  %v3541_v22 = vsub.f32 %v2936_v18, %v2936_v18  ;;  %1376 = vxpose.xlu1.b32.cont [2/8] (short) %v74_v17, 128  ;;  %p3424_p9 = por %p3423_p8, %p3422_p7 }
  0x3b   :  { %v2939_v14 = vsel %vm3504_vm0, 1.0, %v3451_v13  ;;  %v2938_v15 = vsel %vm3509_vm1, 1.0, %v3451_v13  ;;  %v2937_v16 = vsel %vm3514_vm2, 1.0, %v3451_v13  ;;  %3136 = vmatprep.subr.msk.mxu0 %vm3504_vm0, %v5137_v28 }
  0x3c   :  { %v3535_v19 = vsub.f32 %v2939_v14, %v2939_v14  ;;  %v3537_v20 = vsub.f32 %v2938_v15, %v2938_v15  ;;  %v3539_v21 = vsub.f32 %v2937_v16, %v2937_v16  ;;  %v3553_v27 = vand.u32 4294901760, %v3541_v22  ;;  %3137 = vmatpush3.msk.msra.mxu0 %vm3504_vm0, %v5137_v28  ;;  %p3425_p10 = pnand %p3424_p9, %p3418_p6 }
  0x3d   :  { %3138 = vmatprep.subr.msk.mxu0 %vm3509_vm1, %v5137_v28  ;;  %106 = vxpose.xlu0.b32.cont [3/4] (short) %v71_v23, 128 }
  0x3e   :  { %v3544_v24 = vand.u32 4294901760, %v3535_v19  ;;  %v3547_v25 = vand.u32 4294901760, %v3537_v20  ;;  %v3550_v26 = vand.u32 4294901760, %v3539_v21  ;;  %3139 = vmatpush3.msk.msra.mxu0 %vm3509_vm1, %v5137_v28  ;;  %v463_v36 = vsub.f32 %v3541_v22, %v3553_v27  ;;  %1377 = vxpose.xlu1.b32.cont [3/8] (short) %v75_v29, 128 }
  0x3f   :  { %3140 = vmatprep.subr.msk.mxu0 %vm3514_vm2, %v5137_v28 }
  0x40   :  { %v442_v30 = vsub.f32 %v3535_v19, %v3544_v24  ;;  %v449_v31 = vsub.f32 %v3537_v20, %v3547_v25  ;;  %v456_v32 = vsub.f32 %v3539_v21, %v3550_v26  ;;  %3141 = vmatpush3.msk.msra.mxu0 %vm3514_vm2, %v5137_v28  ;;  %v464_v39 = vand.u32 4294901760, %v463_v36 }
  0x41   :  { %3142 = vmatprep.subr.msk.mxu0 %vm3519_vm3, %v5137_v28  ;;  %107 = vxpose.xlu0.b32.end [4/4] (short) %v72_v33, 128 }
  0x42   :  { %v443_v34 = vand.u32 4294901760, %v442_v30  ;;  %v450_v35 = vand.u32 4294901760, %v449_v31  ;;  %v457_v38 = vand.u32 4294901760, %v456_v32  ;;  %1378 = vxpose.xlu1.b32.cont [4/8] (short) %v76_v37, 128  ;;  %3143 = vmatpush3.msk.msra.mxu0 %vm3519_vm3, %v5137_v28 }
  0x43   :  { %3200 = vmatprep.subr.mxu0 %v3535_v19 }
  0x44   :  { %3168 = vmatprep.subr.mxu1 %v443_v34 }
  0x45   :  { %3169 = vmatpush3.msra.mxu1 %v443_v34 }
  0x46   :  { %3170 = vmatprep.subr.mxu1 %v450_v35  ;;  %1379 = vxpose.xlu1.b32.cont [5/8] (short) %v77_v40, 128 }
  0x47   :  { %3171 = vmatpush3.msra.mxu1 %v450_v35 }
  0x48   :  { %3172 = vmatprep.subr.mxu1 %v457_v38 }
  0x49   :  { %3173 = vmatpush3.msra.mxu1 %v457_v38 }
  0x4a   :  { %3174 = vmatprep.subr.mxu1 %v464_v39  ;;  %1380 = vxpose.xlu1.b32.cont [6/8] (short) %v78_v41, 128 }
  0x4b   :  { %3175 = vmatpush3.msra.mxu1 %v464_v39 }
  0x4c   :  { %3232 = vmatprep.subr.msk.mxu1 %vm3504_vm0, %v5137_v28 }
  0x4e   :  { %1381 = vxpose.xlu1.b32.cont [7/8] (short) %v79_v42, 128 }
  0x52   :  { %1382 = vxpose.xlu1.b32.end [8/8] (short) %v80_v43, 128 }
  0xb1   :  { %v120_v44 = vpop.trf.xlu0 }
  0xb2   :  { %v138_v45 = vsel %vm136_vm4, %v120_v44, 0 }
  0xb3   :  { %v3592_v46 = vand.u32 4294901760, %v138_v45 }
  0xb5   :  { %v3595_v47 = vsub.f32 %v138_v45, %v3592_v46  ;;  %3176 = vmatprep.mubr.f32.mxu1 %v3592_v46  ;;  %v121_v48 = vpop.trf.xlu0 }
  0xb6   :  { %v141_v49 = vsel %vm136_vm4, %v121_v48, 0 }
  0xb7   :  { %v3599_v50 = vand.u32 4294901760, %v141_v49  ;;  %v256_v51 = vand.u32 4294901760, %v3595_v47 }
  0xb9   :  { %v3603_v52 = vsub.f32 %v141_v49, %v3599_v50  ;;  %3177 = vmatmul.mubr.f32.vlgmr.msra.gmra.mxu1 %v3599_v50  ;;  %v122_v53 = vpop.trf.xlu0  ;;  %v257_v54 = vsub.f32 %v3595_v47, %v256_v51 }
  0xba   :  { %v144_v55 = vsel %vm136_vm4, %v122_v53, 0  ;;  %3233 = vmatpush3.msk.msra.mxu1 %vm3504_vm0, %v5137_v28 }
  0xbb   :  { %v266_v56 = vand.u32 4294901760, %v3603_v52  ;;  %v3614_v57 = vand.u32 4294901760, %v144_v55  ;;  %v258_v58 = vand.u32 4294901760, %v257_v54  ;;  %3234 = vmatprep.subr.msk.mxu1 %vm3509_vm1, %v5137_v28 }
  0xbc   :  { %3235 = vmatpush3.msk.msra.mxu1 %vm3509_vm1, %v5137_v28 }
  0xbd   :  { %v3623_v59 = vsub.f32 %v144_v55, %v3614_v57  ;;  %3144 = vmatprep.mubr.f32.mxu0 %v258_v58  ;;  %3179 = vmatprep.mubr.f32.mxu1 %v3614_v57  ;;  %v123_v60 = vpop.trf.xlu0  ;;  %v267_v61 = vsub.f32 %v3603_v52, %v266_v56 }
  0xbe   :  { %v147_v62 = vsel %vm136_vm4, %v123_v60, 0  ;;  %3236 = vmatprep.subr.msk.mxu1 %vm3514_vm2, %v5137_v28 }
  0xbf   :  { %v276_v63 = vand.u32 4294901760, %v3623_v59  ;;  %v3634_v5 = vand.u32 4294901760, %v147_v62  ;;  %v268_v6 = vand.u32 4294901760, %v267_v61  ;;  %3237 = vmatpush3.msk.msra.mxu1 %vm3514_vm2, %v5137_v28 }
  0xc0   :  { %3238 = vmatprep.subr.msk.mxu1 %vm3519_vm3, %v5137_v28 }
  0xc1   :  { %v3643_v7 = vsub.f32 %v147_v62, %v3634_v5  ;;  %3145 = vmatmul.mubr.f32.vlgmr.msra.gmra.mxu0 %v268_v6  ;;  %3180 = vmatmul.mubr.f32.gmra.mxu1 %v3634_v5  ;;  %v124_v8 = vpop.trf.xlu0  ;;  %v277_v14 = vsub.f32 %v3623_v59, %v276_v63 }
  0xc2   :  { %v150_v15 = vsel %vm136_vm4, %v124_v8, 0  ;;  %3201 = vmatpush3.msra.mxu0 %v3535_v19  ;;  %3239 = vmatpush3.msk.msra.mxu1 %vm3519_vm3, %v5137_v28 }
  0xc3   :  { %v286_v16 = vand.u32 4294901760, %v3643_v7  ;;  %v3655_v17 = vand.u32 4294901760, %v150_v15  ;;  %v278_v18 = vand.u32 4294901760, %v277_v14  ;;  %3202 = vmatprep.subr.mxu0 %v3537_v20  ;;  %3296 = vmatprep.subr.msk.mxu1 %vm3504_vm0, %v5137_v28 }
  0xc4   :  { %3203 = vmatpush3.msra.mxu0 %v3537_v20 }
  0xc5   :  { %v3663_v23 = vsub.f32 %v150_v15, %v3655_v17  ;;  %3147 = vmatprep.mubr.f32.mxu0 %v278_v18  ;;  %3182 = vmatprep.mubr.f32.mxu1 %v3655_v17  ;;  %v125_v19 = vpop.trf.xlu0  ;;  %v287_v29 = vsub.f32 %v3643_v7, %v286_v16 }
  0xc6   :  { %v153_v30 = vsel %vm136_vm4, %v125_v19, 0  ;;  %3204 = vmatprep.subr.mxu0 %v3539_v21 }
  0xc7   :  { %v296_v31 = vand.u32 4294901760, %v3663_v23  ;;  %v3672_v32 = vand.u32 4294901760, %v153_v30  ;;  %v288_v20 = vand.u32 4294901760, %v287_v29  ;;  %3205 = vmatpush3.msra.mxu0 %v3539_v21 }
  0xc8   :  { %3206 = vmatprep.subr.mxu0 %v3541_v22 }
  0xc9   :  { %v3677_v33 = vsub.f32 %v153_v30, %v3672_v32  ;;  %3148 = vmatmul.mubr.f32.gmra.mxu0 %v288_v20  ;;  %3183 = vmatmul.mubr.f32.gmra.mxu1 %v3672_v32  ;;  %v126_v34 = vpop.trf.xlu0  ;;  %v297_v35 = vsub.f32 %v3663_v23, %v296_v31 }
  0xca   :  { %v156_v36 = vsel %vm136_vm4, %v126_v34, 0  ;;  %3207 = vmatpush3.msra.mxu0 %v3541_v22 }
  0xcb   :  { %v306_v37 = vand.u32 4294901760, %v3677_v33  ;;  %v3686_v21 = vand.u32 4294901760, %v156_v36  ;;  %v298_v38 = vand.u32 4294901760, %v297_v35  ;;  %3264 = vmatprep.subr.mxu0 %v3544_v24 }
  0xcd   :  { %v3690_v39 = vsub.f32 %v156_v36, %v3686_v21  ;;  %3150 = vmatprep.mubr.f32.mxu0 %v298_v38  ;;  %3185 = vmatprep.mubr.f32.mxu1 %v3686_v21  ;;  %v127_v40 = vpop.trf.xlu0  ;;  %v307_v41 = vsub.f32 %v3677_v33, %v306_v37 }
  0xce   :  { %v159_v22 = vsel %vm136_vm4, %v127_v40, 0 }
  0xcf   :  { %v316_v42 = vand.u32 4294901760, %v3690_v39  ;;  %v3698_v43 = vand.u32 4294901760, %v159_v22  ;;  %v308_v44 = vand.u32 4294901760, %v307_v41 }
  0xd1   :  { %v3701_v45 = vsub.f32 %v159_v22, %v3698_v43  ;;  %3151 = vmatmul.mubr.f32.gmra.mxu0 %v308_v44  ;;  %3186 = vmatmul.mubr.f32.gmra.mxu1 %v3698_v43  ;;  %v128_v48 = vpop.trf.xlu0  ;;  %v317_v49 = vsub.f32 %v3690_v39, %v316_v42 }
  0xd2   :  { %v162_v53 = vsel %vm136_vm4, %v128_v48, 0 }
  0xd3   :  { %v326_v54 = vand.u32 4294901760, %v3701_v45  ;;  %v3709_v55 = vand.u32 4294901760, %v162_v53  ;;  %v318_v58 = vand.u32 4294901760, %v317_v49 }
  0xd5   :  { %v3712_v60 = vsub.f32 %v162_v53, %v3709_v55  ;;  %3153 = vmatprep.mubr.f32.mxu0 %v318_v58  ;;  %3188 = vmatprep.mubr.f32.mxu1 %v3709_v55  ;;  %v129_v61 = vpop.trf.xlu0  ;;  %v327_v62 = vsub.f32 %v3701_v45, %v326_v54 }
  0xd6   :  { %v165_v6 = vsel %vm136_vm4, %v129_v61, 0 }
  0xd7   :  { %v5108_v8 = vand.u32 4294901760, %v3712_v60  ;;  %v3720_v14 = vand.u32 4294901760, %v165_v6  ;;  %v328_v15 = vand.u32 4294901760, %v327_v62 }
  0xd9   :  { %v3723_v18 = vsub.f32 %v165_v6, %v3720_v14  ;;  %3154 = vmatmul.mubr.f32.gmra.mxu0 %v328_v15  ;;  %3189 = vmatmul.mubr.f32.gmra.mxu1 %v3720_v14  ;;  %v130_v19 = vpop.trf.xlu0  ;;  %v337_v29 = vsub.f32 %v3712_v60, %v5108_v8 }
  0xda   :  { %v168_v30 = vsel %vm136_vm4, %v130_v19, 0 }
  0xdb   :  { %v5106_v20 = vand.u32 4294901760, %v3723_v18  ;;  %v3731_v34 = vand.u32 4294901760, %v168_v30  ;;  %v338_v35 = vand.u32 4294901760, %v337_v29 }
  0xdd   :  { %v3734_v36 = vsub.f32 %v168_v30, %v3731_v34  ;;  %3156 = vmatprep.mubr.f32.mxu0 %v338_v35  ;;  %3191 = vmatprep.mubr.f32.mxu1 %v3731_v34  ;;  %v131_v38 = vpop.trf.xlu0  ;;  %v347_v40 = vsub.f32 %v3723_v18, %v5106_v20 }
  0xde   :  { %v171_v41 = vsel %vm136_vm4, %v131_v38, 0  ;;  %v1325_v38 = vsub.s32 1, %v3492_v1 }
  0xdf   :  { %v5105_v22 = vand.u32 4294901760, %v3734_v36  ;;  %v3742_v44 = vand.u32 4294901760, %v171_v41  ;;  %v348_v48 = vand.u32 4294901760, %v347_v40  ;;  %v5160_v12 = vand.u32 4294901760, %v3734_v36 }
  0xe1   :  { %v3745_v49 = vsub.f32 %v171_v41, %v3742_v44  ;;  %3157 = vmatmul.mubr.f32.gmra.mxu0 %v348_v48  ;;  %3192 = vmatmul.mubr.f32.gmra.mxu1 %v3742_v44  ;;  %v132_v53 = vpop.trf.xlu0  ;;  %v357_v58 = vsub.f32 %v3734_v36, %v5105_v22 }
  0xe2   :  { %v174_v61 = vsel %vm136_vm4, %v132_v53, 0  ;;  %v82_v53 = vld [vmem:[#allocation5] sm:$0x3] }
  0xe3   :  { %v5104_v62 = vand.u32 4294901760, %v3745_v49  ;;  %v3753_v6 = vand.u32 4294901760, %v174_v61  ;;  %v358_v15 = vand.u32 4294901760, %v357_v58 }
  0xe5   :  { %v3756_v19 = vsub.f32 %v174_v61, %v3753_v6  ;;  %3159 = vmatprep.mubr.f32.mxu0 %v358_v15  ;;  %3194 = vmatprep.mubr.f32.mxu1 %v3753_v6  ;;  %v133_v29 = vpop.trf.xlu0  ;;  %v367_v30 = vsub.f32 %v3745_v49, %v5104_v62  ;;  %v3778_v62 = vrot.slane %v82_v53, %v1325_v38 }
  0xe6   :  { %v177_v35 = vsel %vm136_vm4, %v133_v29, 0 }
  0xe7   :  { %v5107_v40 = vand.u32 4294901760, %v3756_v19  ;;  %v3765_v41 = vand.u32 4294901760, %v177_v35  ;;  %v368_v48 = vand.u32 4294901760, %v367_v30  ;;  %vm1342_vm5 = vcmp.eq.s32.totalorder %v3776_v0, %v3778_v62 }
  0xe8   :  { %vm1334_vm13 = vcmp.eq.s32.totalorder %v3495_v2, %v3778_v62  ;;  %vm1332_vm15 = vcmp.eq.s32.totalorder %v3498_v3, %v3778_v62 }
  0xe9   :  { %v3768_v58 = vsub.f32 %v177_v35, %v3765_v41  ;;  %3160 = vmatmul.mubr.f32.gmra.mxu0 %v368_v48  ;;  %3195 = vmatmul.mubr.f32.gmra.mxu1 %v3765_v41  ;;  %v134_v61 = vpop.trf.xlu0  ;;  %v377_v15 = vsub.f32 %v3756_v19, %v5107_v40 }
  0xea   :  { %v180_v29 = vsel %vm136_vm4, %v134_v61, 0 }
  0xeb   :  { %v5109_v30 = vand.u32 4294901760, %v3768_v58  ;;  %v3781_v22 = vand.u32 4294901760, %v180_v29  ;;  %v378_v35 = vand.u32 4294901760, %v377_v15 }
  0xed   :  { %v3784_v48 = vsub.f32 %v180_v29, %v3781_v22  ;;  %3162 = vmatprep.mubr.f32.mxu0 %v378_v35  ;;  %3197 = vmatprep.mubr.f32.mxu1 %v3781_v22  ;;  %v135_v20 = vpop.trf.xlu0  ;;  %v387_v61 = vsub.f32 %v3768_v58, %v5109_v30 }
  0xee   :  { %v183_v40 = vsel %vm136_vm4, %v135_v20, 0  ;;  %v2967_v20 = vsel %vm1342_vm5, 1.0, %v3451_v13 }
  0xef   :  { %v396_v38 = vand.u32 4294901760, %v3784_v48  ;;  %v3794_v8 = vand.u32 4294901760, %v183_v40  ;;  %v388_v15 = vand.u32 4294901760, %v387_v61 }
  0xf1   :  { %v3797_v29 = vsub.f32 %v183_v40, %v3794_v8  ;;  %3163 = vmatmul.mubr.f32.gmra.mxu0 %v388_v15  ;;  %3198 = vmatmul.mubr.f32.gmra.mxu1 %v3794_v8  ;;  %v397_v35 = vsub.f32 %v3784_v48, %v396_v38  ;;  %v3810_v40 = vsub.f32 %v2967_v20, %v2967_v20 }
  0xf2   :  { %3240 = vmatprep.mubr.f32.mxu1 %v256_v51 }
  0xf3   :  { %v406_v61 = vand.u32 4294901760, %v3797_v29  ;;  %v398_v30 = vand.u32 4294901760, %v397_v35 }
  0xf5   :  { %3165 = vmatprep.mubr.f32.mxu0 %v398_v30  ;;  %3241 = vmatmul.mubr.f32.vlgmr.msra.gmra.mxu1 %v266_v56  ;;  %v407_v15 = vsub.f32 %v3797_v29, %v406_v61  ;;  %v1321_v56 = vsub.s32 0, %v3492_v1  ;;  %v1731_v30 = vand.u32 4294901760, %v3810_v40 }
  0xf6   :  { %3243 = vmatprep.mubr.f32.mxu1 %v276_v63  ;;  %3297 = vmatpush3.msk.msra.mxu1 %vm3504_vm0, %v5137_v28 }
  0xf7   :  { %v408_v51 = vand.u32 4294901760, %v407_v15  ;;  %3298 = vmatprep.subr.msk.mxu1 %vm3509_vm1, %v5137_v28  ;;  %v3841_v9 = vrot.slane %v82_v53, %v1321_v56  ;;  %v1732_v10 = vsub.f32 %v3810_v40, %v1731_v30  ;;  %v5163_v53 = vand.u32 4294901760, %v3768_v58 }
  0xf8   :  { %3299 = vmatpush3.msk.msra.mxu1 %vm3509_vm1, %v5137_v28  ;;  %vm1330_vm1 = vcmp.eq.s32.totalorder %v3501_v4, %v3778_v62 }
  0xf9   :  { %3166 = vmatmul.mubr.f32.gmra.mxu0 %v408_v51  ;;  %3244 = vmatmul.mubr.f32.gmra.mxu1 %v286_v16  ;;  %vm1341_vm6 = vcmp.eq.s32.totalorder %v3776_v0, %v3841_v9  ;;  %v1733_v11 = vand.u32 4294901760, %v1732_v10  ;;  %vm1333_vm14 = vcmp.eq.s32.totalorder %v3495_v2, %v3841_v9  ;;  %vm1331_vm0 = vcmp.eq.s32.totalorder %v3498_v3, %v3841_v9 }
  0xfa   :  { %3208 = vmatprep.mubr.f32.mxu0 %v3595_v47  ;;  %3246 = vmatprep.mubr.f32.mxu1 %v296_v31  ;;  %v3852_v47 = vadd.s32 48, %v3492_v1  ;;  %v3910_v31 = vadd.s32 32, %v3492_v1  ;;  %vm1327_vm4 = vcmp.eq.s32.totalorder %v3492_v1, %v3841_v9 }
  0xfb   :  { %3300 = vmatprep.subr.msk.mxu1 %vm3514_vm2, %v5137_v28 }
  0xfc   :  { %3301 = vmatpush3.msk.msra.mxu1 %vm3514_vm2, %v5137_v28  ;;  %vm1340_vm7 = vcmp.eq.s32.totalorder %v3852_v47, %v3778_v62  ;;  %vm5118_vm8 = vcmp.eq.s32.totalorder %v3852_v47, %v3841_v9  ;;  %vm1336_vm11 = vcmp.eq.s32.totalorder %v3910_v31, %v3778_v62  ;;  %vm1335_vm12 = vcmp.eq.s32.totalorder %v3910_v31, %v3841_v9 }
  0xfd   :  { %3209 = vmatmul.mubr.f32.vlgmr.msra.gmra.mxu0 %v3603_v52  ;;  %3247 = vmatmul.mubr.f32.gmra.mxu1 %v306_v37  ;;  %v2966_v52 = vsel %vm1341_vm6, 1.0, %v3451_v13  ;;  %v2965_v63 = vsel %vm1340_vm7, 1.0, %v3451_v13  ;;  %v5162_v37 = vand.u32 4294901760, %v3756_v19  ;;  %v2961_v51 = vsel %vm1336_vm11, 1.0, %v3451_v13 }
  0xfe   :  { %3265 = vmatpush3.msra.mxu0 %v3544_v24  ;;  %3211 = vmatprep.mubr.f32.mxu0 %v3623_v59  ;;  %v5158_v24 = vand.u32 4294901760, %v3712_v60  ;;  %v5159_v59 = vand.u32 4294901760, %v3723_v18  ;;  %v3903_v16 = vsub.f32 %v2965_v63, %v2965_v63  ;;  %vm1329_vm2 = vcmp.eq.s32.totalorder %v3501_v4, %v3841_v9 }
  0xff   :  { %3249 = vmatprep.mubr.f32.mxu1 %v316_v42  ;;  %3266 = vmatprep.subr.mxu0 %v3547_v25 }
 0x100   :  { %3267 = vmatpush3.msra.mxu0 %v3547_v25  ;;  %3302 = vmatprep.subr.msk.mxu1 %vm3519_vm3, %v5137_v28  ;;  %v3872_v25 = vadd.s32 40, %v3492_v1 }
 0x101   :  { %3212 = vmatmul.mubr.f32.gmra.mxu0 %v3643_v7  ;;  %3250 = vmatmul.mubr.f32.gmra.mxu1 %v326_v54  ;;  %v3900_v7 = vpop.trf.xlu1 }
 0x102   :  { %3214 = vmatprep.mubr.f32.mxu0 %v3663_v23  ;;  %3252 = vmatprep.mubr.f32.mxu1 %v5158_v24  ;;  %vm5112_vm9 = vcmp.eq.s32.totalorder %v3872_v25, %v3778_v62  ;;  %v2964_v23 = vsel %vm5118_vm8, 1.0, %v3451_v13  ;;  %vm1337_vm10 = vcmp.eq.s32.totalorder %v3872_v25, %v3841_v9 }
 0x103   :  { %3268 = vmatprep.subr.mxu0 %v3550_v26  ;;  %3303 = vmatpush3.msk.msra.mxu1 %vm3519_vm3, %v5137_v28  ;;  %v3929_v42 = vsub.f32 %v2964_v23, %v2964_v23  ;;  %vm1328_vm3 = vcmp.eq.s32.totalorder %v3492_v1, %v3778_v62 }
 0x104   :  { %3269 = vmatpush3.msra.mxu0 %v3550_v26  ;;  %1734 = vmatprep.subr.mxu1 %v1733_v11  ;;  %v3895_v26 = vsub.f32 %v2966_v52, %v2966_v52  ;;  %v3975_v11 = vsub.f32 %v2961_v51, %v2961_v51 }
 0x105   :  { %3215 = vmatmul.mubr.f32.gmra.mxu0 %v3677_v33  ;;  %3253 = vmatmul.mubr.f32.gmra.mxu1 %v5159_v59  ;;  %v5161_v33 = vand.u32 4294901760, %v3745_v49  ;;  %v3945_v35 = vpop.trf.xlu1  ;;  %v5127_v15 = vand.u32 4294901760, %v3929_v42 }
 0x106   :  { %3217 = vmatprep.mubr.f32.mxu0 %v3690_v39  ;;  %3255 = vmatprep.mubr.f32.mxu1 %v5160_v12  ;;  %v5131_v39 = vand.u32 4294901760, %v3895_v26  ;;  %v2958_v12 = vsel %vm1333_vm14, 1.0, %v3451_v13  ;;  %v5121_v23 = vand.u32 4294901760, %v3975_v11 }
 0x107   :  { %3270 = vmatprep.subr.mxu0 %v3553_v27  ;;  %v1750_v24 = vsub.f32 %v3929_v42, %v5127_v15 }
 0x108   :  { %3271 = vmatpush3.msra.mxu0 %v3553_v27  ;;  %v2963_v27 = vsel %vm5112_vm9, 1.0, %v3451_v13  ;;  %v1738_v20 = vsub.f32 %v3895_v26, %v5131_v39 }
 0x109   :  { %3218 = vmatmul.mubr.f32.gmra.mxu0 %v3701_v45  ;;  %3256 = vmatmul.mubr.f32.gmra.mxu1 %v5161_v33  ;;  %v5129_v45 = vand.u32 4294901760, %v3903_v16  ;;  %v3932_v54 = vsub.f32 %v2963_v27, %v2963_v27 }
 0x10a   :  { %3220 = vmatprep.mubr.f32.mxu0 %v3712_v60  ;;  %3258 = vmatprep.mubr.f32.mxu1 %v5162_v37  ;;  %v2962_v60 = vsel %vm1337_vm10, 1.0, %v3451_v13  ;;  %v1739_v10 = vand.u32 4294901760, %v1738_v20  ;;  %v2956_v20 = vsel %vm1331_vm0, 1.0, %v3451_v13 }
 0x10b   :  { %2968 = vmatprep.subr.msk.mxu0 %vm1342_vm5, %v5137_v28  ;;  %v5124_v56 = vand.u32 4294901760, %v3932_v54 }
 0x10d   :  { %3221 = vmatmul.mubr.f32.gmra.mxu0 %v3723_v18  ;;  %3259 = vmatmul.mubr.f32.gmra.mxu1 %v5163_v53  ;;  %v3954_v18 = vsub.f32 %v2962_v60, %v2962_v60  ;;  %v1756_v63 = vsub.f32 %v3932_v54, %v5124_v56  ;;  %v2957_v53 = vsel %vm1332_vm15, 1.0, %v3451_v13 }
 0x10e   :  { %3223 = vmatprep.mubr.f32.mxu0 %v3734_v36  ;;  %3261 = vmatprep.mubr.f32.mxu1 %v396_v38  ;;  %v1744_v36 = vsub.f32 %v3903_v16, %v5129_v45  ;;  %v2960_v38 = vsel %vm1335_vm12, 1.0, %v3451_v13 }
 0x10f   :  { %v5123_v52 = vand.u32 4294901760, %v3954_v18  ;;  %v1757_v60 = vand.u32 4294901760, %v1756_v63  ;;  %v2954_v63 = vsel %vm1329_vm2, 1.0, %v3451_v13 }
 0x110   :  { %v1745_v59 = vand.u32 4294901760, %v1744_v36 }
 0x111   :  { %3224 = vmatmul.mubr.f32.gmra.mxu0 %v3745_v49  ;;  %3262 = vmatmul.mubr.f32.gmra.mxu1 %v406_v61  ;;  %v3983_v49 = vsub.f32 %v2960_v38, %v2960_v38  ;;  %v3989_v61 = vpop.trf.xlu1  ;;  %v1762_v27 = vsub.f32 %v3954_v18, %v5123_v52 }
 0x112   :  { %3226 = vmatprep.mubr.f32.mxu0 %v3756_v19  ;;  %3304 = vmatprep.mubr.f32.mxu1 %v3592_v46  ;;  %v2959_v19 = vsel %vm1334_vm13, 1.0, %v3451_v13 }
 0x113   :  { %v4005_v33 = vsub.f32 %v2959_v19, %v2959_v19  ;;  %v5120_v37 = vand.u32 4294901760, %v3983_v49  ;;  %v1763_v38 = vand.u32 4294901760, %v1762_v27  ;;  %v4043_v19 = vsub.f32 %v2956_v20, %v2956_v20 }
 0x114   :  { %v5182_v31 = vand.u32 4294901760, %v3983_v49 }
 0x115   :  { %3227 = vmatmul.mubr.f32.gmra.mxu0 %v3768_v58  ;;  %3305 = vmatmul.mubr.f32.vlgmr.msra.gmra.mxu1 %v3599_v50  ;;  %v1751_v58 = vand.u32 4294901760, %v1750_v24  ;;  %v4027_v51 = vpop.trf.xlu1  ;;  %v5111_v36 = vand.u32 4294901760, %v4005_v33  ;;  %v4040_v24 = vsub.f32 %v2957_v53, %v2957_v53  ;;  %v5188_v3 = vand.u32 4294901760, %v4043_v19 }
 0x116   :  { %3229 = vmatprep.mubr.f32.mxu0 %v3784_v48  ;;  %3307 = vmatprep.mubr.f32.mxu1 %v3614_v57  ;;  %v4013_v48 = vsub.f32 %v2958_v12, %v2958_v12 }
 0x117   :  { %1740 = vmatpush1.msra.mxu1 %v1739_v10  ;;  %v1774_v10 = vsub.f32 %v3983_v49, %v5120_v37  ;;  %v5119_v27 = vand.u32 4294901760, %v4040_v24 }
 0x118   :  { %1746 = vmatprep.subr.mxu1 %v1745_v59  ;;  %v2955_v59 = vsel %vm1330_vm1, 1.0, %v3451_v13 }
 0x119   :  { %3230 = vmatmul.mubr.f32.gmra.mxu0 %v3797_v29  ;;  %3308 = vmatmul.mubr.f32.gmra.mxu1 %v3634_v5  ;;  %v1768_v29 = vsub.f32 %v3975_v11, %v5121_v23  ;;  %v4079_v53 = vpop.trf.xlu1 }
 0x11a   :  { %3272 = vmatprep.mubr.f32.mxu0 %v3592_v46  ;;  %3310 = vmatprep.mubr.f32.mxu1 %v3655_v17  ;;  %v5110_v46 = vand.u32 4294901760, %v4013_v48 }
 0x11b   :  { %1752 = vmatpush1.msra.mxu1 %v1751_v58  ;;  %v1769_v12 = vand.u32 4294901760, %v1768_v29  ;;  %v1775_v58 = vand.u32 4294901760, %v1774_v10  ;;  %v5113_v29 = vand.u32 4294901760, %v4043_v19  ;;  %v4089_v10 = vsub.f32 %v2954_v63, %v2954_v63 }
 0x11c   :  { %1758 = vmatprep.subr.mxu1 %v1757_v60  ;;  %v4073_v60 = vsub.f32 %v2955_v59, %v2955_v59  ;;  %v1786_v20 = vsub.f32 %v4013_v48, %v5110_v46  ;;  %v2952_v59 = vsel %vm1327_vm4, 1.0, %v3451_v13  ;;  %v1792_v46 = vsub.f32 %v4040_v24, %v5119_v27 }
 0x11d   :  { %3273 = vmatmul.mubr.f32.vlgmr.msra.gmra.mxu0 %v3599_v50  ;;  %3311 = vmatmul.mubr.f32.gmra.mxu1 %v3672_v32  ;;  %v1780_v50 = vsub.f32 %v4005_v33, %v5111_v36  ;;  %v4109_v36 = vsub.f32 %v2952_v59, %v2952_v59 }
 0x11e   :  { %2969 = vmatpush1.msk.msra.mxu0 %vm1341_vm6, %v5137_v28  ;;  %3275 = vmatprep.mubr.f32.mxu0 %v3614_v57  ;;  %v2953_v57 = vsel %vm1328_vm3, 1.0, %v3451_v13 }
 0x11f   :  { %3313 = vmatprep.mubr.f32.mxu1 %v3686_v21  ;;  %2970 = vmatprep.subr.msk.mxu0 %vm1340_vm7, %v5137_v28  ;;  %v1781_v63 = vand.u32 4294901760, %v1780_v50  ;;  %v5116_v50 = vand.u32 4294901760, %v4089_v10  ;;  %v5115_v59 = vand.u32 4294901760, %v4109_v36 }
 0x120   :  { %2971 = vmatpush1.msk.msra.mxu0 %vm5118_vm8, %v5137_v28  ;;  %1764 = vmatpush1.msra.mxu1 %v1763_v38  ;;  %v4099_v38 = vsub.f32 %v2953_v57, %v2953_v57  ;;  %v4121_v57 = vpop.trf.xlu1 }
 0x121   :  { %3276 = vmatmul.mubr.f32.gmra.mxu0 %v3634_v5  ;;  %3314 = vmatmul.mubr.f32.gmra.mxu1 %v3698_v43  ;;  %v5117_v5 = vand.u32 4294901760, %v4073_v60 }
 0x122   :  { %3278 = vmatprep.mubr.f32.mxu0 %v3655_v17  ;;  %3316 = vmatprep.mubr.f32.mxu1 %v3709_v55  ;;  %v1787_v17 = vand.u32 4294901760, %v1786_v20  ;;  %v1793_v20 = vand.u32 4294901760, %v1792_v46  ;;  %v1810_v46 = vsub.f32 %v4089_v10, %v5116_v50 }
 0x123   :  { %2972 = vmatprep.subr.msk.mxu0 %vm5112_vm9, %v5137_v28  ;;  %1770 = vmatprep.subr.mxu1 %v1769_v12  ;;  %v1798_v12 = vsub.f32 %v4043_v19, %v5113_v29  ;;  %vm1407_vm9 = vcmask 523264  }
 0x124   :  { %2973 = vmatpush1.msk.msra.mxu0 %vm1337_vm10, %v5137_v28  ;;  %1776 = vmatpush1.msra.mxu1 %v1775_v58  ;;  %v5114_v58 = vand.u32 4294901760, %v4099_v38 }
 0x125   :  { %3279 = vmatmul.mubr.f32.gmra.mxu0 %v3672_v32  ;;  %3317 = vmatmul.mubr.f32.gmra.mxu1 %v3720_v14  ;;  %v1804_v32 = vsub.f32 %v4073_v60, %v5117_v5  ;;  %v1799_v29 = vand.u32 4294901760, %v1798_v12  ;;  %v4161_v12 = vpop.trf.xlu1 }
 0x126   :  { %3281 = vmatprep.mubr.f32.mxu0 %v3686_v21  ;;  %3319 = vmatprep.mubr.f32.mxu1 %v3731_v34  ;;  %v1409_v21 = vsel %vm1407_vm9, %v3900_v7, 0 }
 0x127   :  { %2974 = vmatprep.subr.msk.mxu0 %vm1336_vm11, %v5137_v28  ;;  %1782 = vmatprep.subr.mxu1 %v1781_v63  ;;  %v1816_v63 = vsub.f32 %v4099_v38, %v5114_v58  ;;  %v4154_v7 = vand.u32 4294901760, %v1409_v21  ;;  %v1811_v58 = vand.u32 4294901760, %v1810_v46 }
 0x128   :  { %2975 = vmatpush1.msk.msra.mxu0 %vm1335_vm12, %v5137_v28  ;;  %1788 = vmatpush1.msra.mxu1 %v1787_v17  ;;  %v1805_v17 = vand.u32 4294901760, %v1804_v32 }
 0x129   :  { %3282 = vmatmul.mubr.f32.gmra.mxu0 %v3698_v43  ;;  %3320 = vmatmul.mubr.f32.gmra.mxu1 %v3742_v44  ;;  %v1412_v43 = vsel %vm1407_vm9, %v3945_v35, 0  ;;  %v4174_v32 = vsub.f32 %v1409_v21, %v4154_v7 }
 0x12a   :  { %3284 = vmatprep.mubr.f32.mxu0 %v3709_v55  ;;  %3322 = vmatprep.mubr.f32.mxu1 %v3753_v6  ;;  %v1822_v55 = vsub.f32 %v4109_v36, %v5115_v59  ;;  %v4171_v35 = vand.u32 4294901760, %v1412_v43  ;;  %v1427_v59 = vsel %vm1407_vm9, %v4161_v12, 0 }
 0x12b   :  { %2976 = vmatprep.subr.msk.mxu0 %vm1334_vm13, %v5137_v28  ;;  %1794 = vmatprep.subr.mxu1 %v1793_v20  ;;  %v1817_v20 = vand.u32 4294901760, %v1816_v63 }
 0x12c   :  { %2977 = vmatpush1.msk.msra.mxu0 %vm1333_vm14, %v5137_v28  ;;  %1800 = vmatpush1.msra.mxu1 %v1799_v29  ;;  %v1823_v29 = vand.u32 4294901760, %v1822_v55  ;;  %v4189_v21 = vsub.f32 %v1412_v43, %v4171_v35 }
 0x12d   :  { %3285 = vmatmul.mubr.f32.gmra.mxu0 %v3720_v14  ;;  %3323 = vmatmul.mubr.f32.gmra.mxu1 %v3765_v41  ;;  %v1415_v14 = vsel %vm1407_vm9, %v3989_v61, 0  ;;  %v5135_v61 = vand.u32 4294901760, %v4174_v32 }
 0x12e   :  { %3287 = vmatprep.mubr.f32.mxu0 %v3731_v34  ;;  %3325 = vmatprep.mubr.f32.mxu1 %v3781_v22  ;;  %v1398_v34 = vpop.trf.xlu1  ;;  %v4192_v46 = vand.u32 4294901760, %v1415_v14 }
 0x12f   :  { %2978 = vmatprep.subr.msk.mxu0 %vm1332_vm15, %v5137_v28  ;;  %1806 = vmatprep.subr.mxu1 %v1805_v17  ;;  %v1430_v5 = vsel %vm1407_vm9, %v1398_v34, 0 }
 0x130   :  { %2979 = vmatpush1.msk.msra.mxu0 %vm1331_vm0, %v5137_v28  ;;  %1812 = vmatpush1.msra.mxu1 %v1811_v58  ;;  %v4210_v58 = vsub.f32 %v1415_v14, %v4192_v46 }
 0x131   :  { %3288 = vmatmul.mubr.f32.gmra.mxu0 %v3742_v44  ;;  %3326 = vmatmul.mubr.f32.gmra.mxu1 %v3794_v8  ;;  %v1418_v44 = vsel %vm1407_vm9, %v4027_v51, 0  ;;  %v1540_v51 = vsub.f32 %v4174_v32, %v5135_v61 }
 0x132   :  { %3290 = vmatprep.mubr.f32.mxu0 %v3753_v6  ;;  %1818 = vmatprep.subr.mxu1 %v1817_v20  ;;  %v5134_v6 = vand.u32 4294901760, %v4189_v21  ;;  %v1399_v63 = vpop.trf.xlu1  ;;  %v5132_v43 = vand.u32 4294901760, %v4210_v58  ;;  %v5173_v0 = vand.u32 4294901760, %v4210_v58 }
 0x133   :  { %2980 = vmatprep.subr.msk.mxu0 %vm1330_vm1, %v5137_v28  ;;  %1824 = vmatpush1.msra.mxu1 %v1823_v29 }
 0x134   :  { %1857 = vmatprep.mubr.f32.mxu1 %v3451_v13  ;;  %2981 = vmatpush1.msk.msra.mxu0 %vm1329_vm2, %v5137_v28  ;;  %v1551_v17 = vsub.f32 %v4189_v21, %v5134_v6 }
 0x135   :  { %3291 = vmatmul.mubr.f32.gmra.mxu0 %v3765_v41  ;;  %1859 = vmatmul.mubr.f32.vlgmr.msra.gmra.mxu1 %v4154_v7  ;;  %v4221_v41 = vand.u32 4294901760, %v1418_v44 }
 0x136   :  { %3293 = vmatprep.mubr.f32.mxu0 %v3781_v22  ;;  %2982 = vmatprep.subr.msk.mxu0 %vm1328_vm3, %v5137_v28  ;;  %v1421_v22 = vsel %vm1407_vm9, %v4079_v53, 0  ;;  %v1541_v53 = vand.u32 4294901760, %v1540_v51  ;;  %v1400_v29 = vpop.trf.xlu1  ;;  %v1552_v14 = vand.u32 4294901760, %v1551_v17 }
 0x137   :  { %1864 = vmatprep.mubr.f32.mxu1 %v3451_v13  ;;  %2983 = vmatpush1.msk.msra.mxu0 %vm1327_vm4, %v5137_v28  ;;  %v4243_v55 = vsub.f32 %v1418_v44, %v4221_v41  ;;  %v4245_v20 = vand.u32 4294901760, %v1421_v22  ;;  %v1562_v44 = vsub.f32 %v4210_v58, %v5132_v43 }
 0x138   :  { %1988 = vmatprep.subr.mxu0 %v3810_v40  ;;  %2984 = vmatprep.subr.msk.mxu1 %vm1342_vm5, %v5137_v28 }
 0x139   :  { %3294 = vmatmul.mubr.f32.gmra.mxu0 %v3794_v8  ;;  %1866 = vmatmul.mubr.f32.gmra.mxu1 %v4171_v35  ;;  %v1424_v8 = vsel %vm1407_vm9, %v4121_v57, 0  ;;  %v5126_v57 = vand.u32 4294901760, %v4243_v55  ;;  %v4265_v51 = vsub.f32 %v1421_v22, %v4245_v20  ;;  %v4281_v22 = vand.u32 4294901760, %v1427_v59 }
 0x13a   :  { %1536 = vmatprep.mubr.f32.mxu0 %v3451_v13  ;;  %1871 = vmatprep.mubr.f32.mxu1 %v3451_v13  ;;  %v1563_v17 = vand.u32 4294901760, %v1562_v44  ;;  %v1401_v27 = vpop.trf.xlu1 }
 0x13b   :  { %2985 = vmatpush1.msk.msra.mxu1 %vm1341_vm6, %v5137_v28  ;;  %v5122_v50 = vand.u32 4294901760, %v4265_v51  ;;  %v4303_v34 = vsub.f32 %v1427_v59, %v4281_v22  ;;  %v1433_v59 = vsel %vm1407_vm9, %v1399_v63, 0 }
 0x13c   :  { %2986 = vmatprep.subr.msk.mxu1 %vm1340_vm7, %v5137_v28  ;;  %v4331_v63 = vand.u32 4294901760, %v1433_v59 }
 0x13d   :  { %1542 = vmatmul.mubr.f32.vlgmr.msra.gmra.mxu0 %v1541_v53  ;;  %1873 = vmatmul.mubr.f32.gmra.mxu1 %v4192_v46  ;;  %v4268_v53 = vand.u32 4294901760, %v1424_v8  ;;  %v1584_v23 = vsub.f32 %v4265_v51, %v5122_v50 }
 0x13e   :  { %1991 = vmatpush1.msra.mxu0 %v3895_v26  ;;  %1547 = vmatprep.mubr.f32.mxu0 %v3451_v13 }
 0x13f   :  { %1878 = vmatprep.mubr.f32.mxu1 %v3451_v13  ;;  %1994 = vmatprep.subr.mxu0 %v3903_v16  ;;  %v4285_v12 = vsub.f32 %v1424_v8, %v4268_v53  ;;  %v4307_v8 = vand.u32 4294901760, %v1430_v5  ;;  %v1585_v52 = vand.u32 4294901760, %v1584_v23 }
 0x140   :  { %1997 = vmatpush1.msra.mxu0 %v3929_v42  ;;  %2987 = vmatpush1.msk.msra.mxu1 %vm5118_vm8, %v5137_v28  ;;  %vm5164_vm8 = vcmp.eq.s32.totalorder %v3872_v25, %v3778_v62 }
 0x141   :  { %1553 = vmatmul.mubr.f32.gmra.mxu0 %v1552_v14  ;;  %1880 = vmatmul.mubr.f32.gmra.mxu1 %v4221_v41  ;;  %v1573_v14 = vsub.f32 %v4243_v55, %v5126_v57  ;;  %v5125_v44 = vand.u32 4294901760, %v4285_v12  ;;  %v4327_v50 = vsub.f32 %v1430_v5, %v4307_v8 }
 0x142   :  { %1558 = vmatprep.mubr.f32.mxu0 %v3451_v13  ;;  %1885 = vmatprep.mubr.f32.mxu1 %v3451_v13 }
 0x143   :  { %2000 = vmatprep.subr.mxu0 %v3932_v54  ;;  %2988 = vmatprep.subr.msk.mxu1 %vm5164_vm8, %v5137_v28  ;;  %v1574_v37 = vand.u32 4294901760, %v1573_v14  ;;  %v5128_v14 = vand.u32 4294901760, %v4303_v34  ;;  %v1595_v56 = vsub.f32 %v4285_v12, %v5125_v44  ;;  %v5130_v23 = vand.u32 4294901760, %v4327_v50 }
 0x144   :  { %2003 = vmatpush1.msra.mxu0 %v3954_v18  ;;  %2989 = vmatpush1.msk.msra.mxu1 %vm1337_vm10, %v5137_v28 }
 0x145   :  { %1564 = vmatmul.mubr.f32.gmra.mxu0 %v1563_v17  ;;  %1887 = vmatmul.mubr.f32.gmra.mxu1 %v4245_v20  ;;  %v1402_v17 = vpop.trf.xlu1  ;;  %v1606_v5 = vsub.f32 %v4303_v34, %v5128_v14  ;;  %v1596_v57 = vand.u32 4294901760, %v1595_v56 }
 0x146   :  { %1569 = vmatprep.mubr.f32.mxu0 %v3451_v13  ;;  %1892 = vmatprep.mubr.f32.mxu1 %v3451_v13 }
 0x147   :  { %2006 = vmatprep.subr.mxu0 %v3975_v11  ;;  %2990 = vmatprep.subr.msk.mxu1 %vm1336_vm11, %v5137_v28  ;;  %v1607_v56 = vand.u32 4294901760, %v1606_v5 }
 0x148   :  { %2009 = vmatpush1.msra.mxu0 %v3983_v49  ;;  %2991 = vmatpush1.msk.msra.mxu1 %vm1335_vm12, %v5137_v28 }
 0x149   :  { %1575 = vmatmul.mubr.f32.gmra.mxu0 %v1574_v37  ;;  %1894 = vmatmul.mubr.f32.gmra.mxu1 %v4268_v53  ;;  %v1436_v37 = vsel %vm1407_vm9, %v1400_v29, 0  ;;  %v4355_v29 = vsub.f32 %v1433_v59, %v4331_v63  ;;  %v1403_v15 = vpop.trf.xlu1  ;;  %v1617_v59 = vsub.f32 %v4327_v50, %v5130_v23 }
 0x14a   :  { %1580 = vmatprep.mubr.f32.mxu0 %v3451_v13  ;;  %1899 = vmatprep.mubr.f32.mxu1 %v3451_v13  ;;  %v4357_v44 = vand.u32 4294901760, %v1436_v37 }
 0x14b   :  { %2012 = vmatprep.subr.mxu0 %v4005_v33  ;;  %2992 = vmatprep.subr.msk.mxu1 %vm1334_vm13, %v5137_v28  ;;  %v1618_v39 = vand.u32 4294901760, %v1617_v59 }
 0x14c   :  { %2015 = vmatpush1.msra.mxu0 %v4013_v48  ;;  %2993 = vmatpush1.msk.msra.mxu1 %vm1333_vm14, %v5137_v28  ;;  %v4378_v14 = vsub.f32 %v1436_v37, %v4357_v44 }
 0x14d   :  { %1586 = vmatmul.mubr.f32.gmra.mxu0 %v1585_v52  ;;  %1901 = vmatmul.mubr.f32.gmra.mxu1 %v4281_v22  ;;  %v1439_v52 = vsel %vm1407_vm9, %v1401_v27, 0  ;;  %v5133_v27 = vand.u32 4294901760, %v4355_v29  ;;  %v1404_v37 = vpop.trf.xlu1 }
 0x14e   :  { %1591 = vmatprep.mubr.f32.mxu0 %v3451_v13  ;;  %1906 = vmatprep.mubr.f32.mxu1 %v3451_v13  ;;  %v4380_v45 = vand.u32 4294901760, %v1439_v52  ;;  %v5136_v5 = vand.u32 4294901760, %v4378_v14  ;;  %v5195_v1 = vand.u32 4294901760, %v4378_v14 }
 0x14f   :  { %2018 = vmatprep.subr.mxu0 %v4040_v24  ;;  %2994 = vmatprep.subr.msk.mxu1 %vm1332_vm15, %v5137_v28  ;;  %v1628_v43 = vsub.f32 %v4355_v29, %v5133_v27 }
 0x150   :  { %2021 = vmatpush1.msra.mxu0 %v4043_v19  ;;  %2995 = vmatpush1.msk.msra.mxu1 %vm1331_vm0, %v5137_v28  ;;  %5165 = vst [vmem:[#allocation15_spill] sm:$0xff] %v4380_v45  ;;  %v4400_v23 = vsub.f32 %v1439_v52, %v4380_v45  ;;  %v1639_v6 = vsub.f32 %v4378_v14, %v5136_v5 }
 0x151   :  { %1597 = vmatmul.mubr.f32.gmra.mxu0 %v1596_v57  ;;  %1908 = vmatmul.mubr.f32.gmra.mxu1 %v4307_v8  ;;  %v1442_v57 = vsel %vm1407_vm9, %v1402_v17, 0  ;;  %v1629_v27 = vand.u32 4294901760, %v1628_v43  ;;  %v1405_v61 = vpop.trf.xlu1 }
 0x152   :  { %1602 = vmatprep.mubr.f32.mxu0 %v3451_v13  ;;  %1913 = vmatprep.mubr.f32.mxu1 %v3451_v13  ;;  %v4396_v17 = vand.u32 4294901760, %v1442_v57  ;;  %v5139_v59 = vand.u32 4294901760, %v4400_v23 }
 0x153   :  { %2024 = vmatprep.subr.mxu0 %v4073_v60  ;;  %2996 = vmatprep.subr.msk.mxu1 %vm1330_vm1, %v5137_v28 }
 0x154   :  { %2027 = vmatpush1.msra.mxu0 %v4089_v10  ;;  %2997 = vmatpush1.msk.msra.mxu1 %vm1329_vm2, %v5137_v28  ;;  %5166 = vst [vmem:[#allocation16_spill] sm:$0xff] %v4396_v17  ;;  %v4418_v52 = vsub.f32 %v1442_v57, %v4396_v17  ;;  %v1650_v5 = vsub.f32 %v4400_v23, %v5139_v59 }
 0x155   :  { %1608 = vmatmul.mubr.f32.gmra.mxu0 %v1607_v56  ;;  %1915 = vmatmul.mubr.f32.gmra.mxu1 %v4331_v63  ;;  %v1445_v56 = vsel %vm1407_vm9, %v1403_v15, 0 }
 0x156   :  { %1613 = vmatprep.mubr.f32.mxu0 %v3451_v13  ;;  %1920 = vmatprep.mubr.f32.mxu1 %v3451_v13  ;;  %v4423_v15 = vand.u32 4294901760, %v1445_v56  ;;  %v5142_v43 = vand.u32 4294901760, %v4418_v52 }
 0x157   :  { %2998 = vmatprep.subr.msk.mxu1 %vm1328_vm3, %v5137_v28  ;;  %2030 = vmatprep.subr.mxu0 %v4099_v38 }
 0x158   :  { %2999 = vmatpush1.msk.msra.mxu1 %vm1327_vm4, %v5137_v28  ;;  %2033 = vmatpush1.msra.mxu0 %v4109_v36  ;;  %v4440_v57 = vsub.f32 %v1445_v56, %v4423_v15  ;;  %v1661_v56 = vsub.f32 %v4418_v52, %v5142_v43 }
 0x159   :  { %1619 = vmatmul.mubr.f32.gmra.mxu0 %v1618_v39  ;;  %1922 = vmatmul.mubr.f32.gmra.mxu1 %v4357_v44  ;;  %v1448_v39 = vsel %vm1407_vm9, %v1404_v37, 0  ;;  %v1406_v37 = vpop.trf.xlu1 }
 0x15a   :  { %1624 = vmatprep.mubr.f32.mxu0 %v3451_v13  ;;  %1927 = vmatprep.mubr.f32.mxu1 %v3451_v13  ;;  %v4442_v40 = vand.u32 4294901760, %v1448_v39 }
 0x15b   :  { %2439 = vmatprep.subr.mxu0 %v1731_v30  ;;  %3000 = vmatprep.subr.msk.mxu1 %vm1342_vm5, %v5137_v28  ;;  %v1640_v30 = vand.u32 4294901760, %v1639_v6  ;;  %vm5171_vm5 = vcmp.eq.s32.totalorder %v3852_v47, %v3841_v9  ;;  %v5175_v47 = vand.u32 4294901760, %v3903_v16 }
 0x15c   :  { %v4456_v28 = vsub.f32 %v1448_v39, %v4442_v40 }
 0x15d   :  { %1630 = vmatmul.mubr.f32.gmra.mxu0 %v1629_v27  ;;  %1929 = vmatmul.mubr.f32.gmra.mxu1 %v4380_v45  ;;  %v1451_v27 = vsel %vm1407_vm9, %v1405_v61, 0  ;;  %v1651_v61 = vand.u32 4294901760, %v1650_v5  ;;  %v5167_v45 = vand.u32 4294901760, %v4440_v57 }
 0x15e   :  { %1635 = vmatprep.mubr.f32.mxu0 %v3451_v13  ;;  %1934 = vmatprep.mubr.f32.mxu1 %v3451_v13  ;;  %v4458_v59 = vand.u32 4294901760, %v1451_v27  ;;  %v5145_v43 = vand.u32 4294901760, %v4456_v28 }
 0x15f   :  { %v1672_v5 = vsub.f32 %v4440_v57, %v5167_v45 }
 0x160   :  { %v4466_v6 = vsub.f32 %v1451_v27, %v4458_v59 }
 0x161   :  { %1641 = vmatmul.mubr.f32.gmra.mxu0 %v1640_v30  ;;  %1936 = vmatmul.mubr.f32.gmra.mxu1 %v4396_v17  ;;  %v1454_v30 = vsel %vm1407_vm9, %v1406_v37, 0  ;;  %v1662_v17 = vand.u32 4294901760, %v1661_v56  ;;  %v1673_v27 = vand.u32 4294901760, %v1672_v5 }
 0x162   :  { %1646 = vmatprep.mubr.f32.mxu0 %v3451_v13  ;;  %1941 = vmatprep.mubr.f32.mxu1 %v3451_v13  ;;  %v4468_v39 = vand.u32 4294901760, %v1454_v30  ;;  %v1693_v37 = vand.u32 4294901760, %v4466_v6 }
 0x164   :  { %v4478_v56 = vsub.f32 %v1454_v30, %v4468_v39  ;;  %v1694_v30 = vsub.f32 %v4466_v6, %v1693_v37 }
 0x165   :  { %1652 = vmatmul.mubr.f32.gmra.mxu0 %v1651_v61  ;;  %1943 = vmatmul.mubr.f32.gmra.mxu1 %v4423_v15  ;;  %v1683_v61 = vsub.f32 %v4456_v28, %v5145_v43  ;;  %v5168_v43 = vand.u32 4294901760, %v4174_v32 }
 0x166   :  { %1657 = vmatprep.mubr.f32.mxu0 %v3451_v13  ;;  %1948 = vmatprep.mubr.f32.mxu1 %v3451_v13  ;;  %v1704_v45 = vand.u32 4294901760, %v4478_v56  ;;  %v1695_v5 = vand.u32 4294901760, %v1694_v30  ;;  %v5170_v30 = vand.u32 4294901760, %v4189_v21 }
 0x169   :  { %1663 = vmatmul.mubr.f32.gmra.mxu0 %v1662_v17  ;;  %1950 = vmatmul.mubr.f32.gmra.mxu1 %v4442_v40  ;;  %v1684_v17 = vand.u32 4294901760, %v1683_v61 }
 0x16a   :  { %1668 = vmatprep.mubr.f32.mxu0 %v3451_v13  ;;  %1955 = vmatprep.mubr.f32.mxu1 %v3451_v13 }
 0x16d   :  { %1674 = vmatmul.mubr.f32.gmra.mxu0 %v1673_v27  ;;  %1957 = vmatmul.mubr.f32.gmra.mxu1 %v4458_v59  ;;  %v1705_v27 = vsub.f32 %v4478_v56, %v1704_v45 }
 0x16e   :  { %1679 = vmatprep.mubr.f32.mxu0 %v3451_v13  ;;  %1962 = vmatprep.mubr.f32.mxu1 %v3451_v13 }
 0x16f   :  { %v1706_v61 = vand.u32 4294901760, %v1705_v27  ;;  %v5176_v27 = vand.u32 4294901760, %v3929_v42 }
 0x171   :  { %1685 = vmatmul.mubr.f32.gmra.mxu0 %v1684_v17  ;;  %1964 = vmatmul.mubr.f32.gmra.mxu1 %v4468_v39  ;;  %v5169_v17 = vmov 1.0  }
 0x172   :  { %1690 = vmatprep.mubr.f32.mxu0 %v3451_v13  ;;  %2275 = vmatprep.mubr.f32.mxu1 %v3451_v13 }
 0x175   :  { %1696 = vmatmul.mubr.f32.gmra.mxu0 %v1695_v5  ;;  %2279 = vmatmul.mubr.f32.vlgmr.msra.gmra.mxu1 %v5168_v43  ;;  %v5174_v43 = vand.u32 4294901760, %v3895_v26  ;;  %v5177_v26 = vand.u32 4294901760, %v4243_v55 }
 0x176   :  { %1701 = vmatprep.mubr.f32.mxu0 %v3451_v13  ;;  %2284 = vmatprep.mubr.f32.mxu1 %v3451_v13 }
 0x177   :  { %3001 = vmatpush1.msk.msra.mxu1 %vm1341_vm6, %v5169_v17  ;;  %vm5172_vm6 = vmmov %vm5164_vm8 }
 0x178   :  { %3002 = vmatprep.subr.msk.mxu1 %vm1340_vm7, %v5169_v17 }
 0x179   :  { %1707 = vmatmul.mubr.f32.gmra.mxu0 %v1706_v61  ;;  %2288 = vmatmul.mubr.f32.gmra.mxu1 %v5170_v30  ;;  %v3178_v5 = vpop.f32.mrf.mxu1  ;;  %v5178_v30 = vand.u32 4294901760, %v3932_v54  ;;  %v5180_v54 = vand.u32 4294901760, %v4265_v51 }
 0x17a   :  { %2066 = vmatprep.mubr.f32.mxu0 %v3451_v13  ;;  %2293 = vmatprep.mubr.f32.mxu1 %v3451_v13 }
 0x17b   :  { %3003 = vmatpush1.msk.msra.mxu1 %vm5171_vm5, %v5169_v17  ;;  %v501_v16 = vpop.f32.mrf.mxu1 }
 0x17c   :  { %3004 = vmatprep.subr.msk.mxu1 %vm5172_vm6, %v5169_v17 }
 0x17d   :  { %2069 = vmatmul.mubr.f32.vlgmr.msra.gmra.mxu0 %v4174_v32  ;;  %2297 = vmatmul.mubr.f32.gmra.mxu1 %v5173_v0 }
 0x17e   :  { %2443 = vmatpush1.msra.mxu0 %v5174_v43  ;;  %2074 = vmatprep.mubr.f32.mxu0 %v3451_v13  ;;  %v5181_v43 = vand.u32 4294901760, %v3975_v11 }
 0x17f   :  { %2302 = vmatprep.mubr.f32.mxu1 %v3451_v13  ;;  %2447 = vmatprep.subr.mxu0 %v5175_v47  ;;  %v5184_v47 = vand.u32 4294901760, %v4005_v33  ;;  %v5186_v33 = vand.u32 4294901760, %v4303_v34 }
 0x180   :  { %2451 = vmatpush1.msra.mxu0 %v5176_v27  ;;  %3005 = vmatpush1.msk.msra.mxu1 %vm1337_vm10, %v5169_v17 }
 0x181   :  { %v3146_v32 = vpop.f32.mrf.mxu0  ;;  %2077 = vmatmul.mubr.f32.gmra.mxu0 %v4189_v21  ;;  %2306 = vmatmul.mubr.f32.gmra.mxu1 %v5177_v26  ;;  %v5179_v21 = vand.u32 4294901760, %v3954_v18  ;;  %v3181_v0 = vpop.f32.mrf.mxu1 }
 0x182   :  { %v4538_v61 = vadd.f32 %v3178_v5, %v3146_v32  ;;  %2082 = vmatprep.mubr.f32.mxu0 %v3451_v13  ;;  %2311 = vmatprep.mubr.f32.mxu1 %v3451_v13  ;;  %v5187_v32 = vand.u32 4294901760, %v4040_v24 }
 0x183   :  { %v260_v42 = vpop.f32.mrf.mxu0  ;;  %2455 = vmatprep.subr.mxu0 %v5178_v30  ;;  %3006 = vmatprep.subr.msk.mxu1 %vm1336_vm11, %v5169_v17  ;;  %v513_v5 = vpop.f32.mrf.mxu1 }
 0x184   :  { %v4548_v25 = vadd.f32 %v501_v16, %v260_v42  ;;  %2459 = vmatpush1.msra.mxu0 %v5179_v21  ;;  %3007 = vmatpush1.msk.msra.mxu1 %vm1335_vm12, %v5169_v17  ;;  %v5190_v16 = vand.u32 4294901760, %v4073_v60  ;;  %v5192_v60 = vand.u32 4294901760, %v4355_v29  ;;  %v5193_v42 = vand.u32 4294901760, %v4099_v38 }
 0x185   :  { %2085 = vmatmul.mubr.f32.gmra.mxu0 %v4210_v58  ;;  %2315 = vmatmul.mubr.f32.gmra.mxu1 %v5180_v54  ;;  %v5183_v58 = vand.u32 4294901760, %v4285_v12  ;;  %v5197_v54 = vand.u32 4294901760, %v4418_v52 }
 0x186   :  { %2090 = vmatprep.mubr.f32.mxu0 %v3451_v13  ;;  %2320 = vmatprep.mubr.f32.mxu1 %v3451_v13 }
 0x187   :  { %2463 = vmatprep.subr.mxu0 %v5181_v43  ;;  %3008 = vmatprep.subr.msk.mxu1 %vm1334_vm13, %v5169_v17 }
 0x188   :  { %2467 = vmatpush1.msra.mxu0 %v5182_v31  ;;  %3009 = vmatpush1.msk.msra.mxu1 %vm1333_vm14, %v5169_v17 }
 0x189   :  { %v3149_v18 = vpop.f32.mrf.mxu0  ;;  %2093 = vmatmul.mubr.f32.gmra.mxu0 %v4243_v55  ;;  %2324 = vmatmul.mubr.f32.gmra.mxu1 %v5183_v58  ;;  %v5185_v55 = vand.u32 4294901760, %v4013_v48  ;;  %v3184_v27 = vpop.f32.mrf.mxu1  ;;  %v5198_v58 = vand.u32 4294901760, %v4440_v57 }
 0x18a   :  { %v4576_v11 = vadd.f32 %v3181_v0, %v3149_v18  ;;  %2098 = vmatprep.mubr.f32.mxu0 %v3451_v13  ;;  %2329 = vmatprep.mubr.f32.mxu1 %v3451_v13 }
 0x18b   :  { %v280_v49 = vpop.f32.mrf.mxu0  ;;  %2471 = vmatprep.subr.mxu0 %v5184_v47  ;;  %3010 = vmatprep.subr.msk.mxu1 %vm1332_vm15, %v5169_v17  ;;  %v525_v26 = vpop.f32.mrf.mxu1 }
 0x18c   :  { %v4586_v2 = vadd.f32 %v513_v5, %v280_v49  ;;  %2475 = vmatpush1.msra.mxu0 %v5185_v55  ;;  %3011 = vmatpush1.msk.msra.mxu1 %vm1331_vm0, %v5169_v17  ;;  %v5199_v49 = vand.u32 4294901760, %v4456_v28 }
 0x18d   :  { %2101 = vmatmul.mubr.f32.gmra.mxu0 %v4265_v51  ;;  %2333 = vmatmul.mubr.f32.gmra.mxu1 %v5186_v33  ;;  %v5189_v51 = vand.u32 4294901760, %v4327_v50 }
 0x18e   :  { %2106 = vmatprep.mubr.f32.mxu0 %v3451_v13  ;;  %2338 = vmatprep.mubr.f32.mxu1 %v3451_v13 }
 0x18f   :  { %2479 = vmatprep.subr.mxu0 %v5187_v32  ;;  %3012 = vmatprep.subr.msk.mxu1 %vm1330_vm1, %v5169_v17 }
 0x190   :  { %2483 = vmatpush1.msra.mxu0 %v5188_v3  ;;  %3013 = vmatpush1.msk.msra.mxu1 %vm1329_vm2, %v5169_v17 }
 0x191   :  { %v3152_v48 = vpop.f32.mrf.mxu0  ;;  %2109 = vmatmul.mubr.f32.gmra.mxu0 %v4285_v12  ;;  %2342 = vmatmul.mubr.f32.gmra.mxu1 %v5189_v51  ;;  %v5191_v12 = vand.u32 4294901760, %v4089_v10  ;;  %v3187_v62 = vpop.f32.mrf.mxu1  ;;  %v5194_v10 = vand.u32 4294901760, %v4109_v36  ;;  %v5196_v36 = vand.u32 4294901760, %v4400_v23 }
 0x192   :  { %v4614_v24 = vadd.f32 %v3184_v27, %v3152_v48  ;;  %2114 = vmatprep.mubr.f32.mxu0 %v3451_v13  ;;  %2347 = vmatprep.mubr.f32.mxu1 %v3451_v13 }
 0x193   :  { %v300_v19 = vpop.f32.mrf.mxu0  ;;  %2487 = vmatprep.subr.mxu0 %v5190_v16  ;;  %3014 = vmatprep.subr.msk.mxu1 %vm1328_vm3, %v5169_v17 }
 0x194   :  { %v4624_v4 = vadd.f32 %v525_v26, %v300_v19  ;;  %2491 = vmatpush1.msra.mxu0 %v5191_v12  ;;  %3015 = vmatpush1.msk.msra.mxu1 %vm1327_vm4, %v5169_v17 }
 0x195   :  { %2117 = vmatmul.mubr.f32.gmra.mxu0 %v4303_v34  ;;  %2351 = vmatmul.mubr.f32.gmra.mxu1 %v5192_v60  ;;  %v537_v34 = vpop.f32.mrf.mxu1 }
 0x196   :  { %2122 = vmatprep.mubr.f32.mxu0 %v3451_v13  ;;  %2356 = vmatprep.mubr.f32.mxu1 %v3451_v13 }
 0x197   :  { %2495 = vmatprep.subr.mxu0 %v5193_v42 }
 0x198   :  { %2499 = vmatpush1.msra.mxu0 %v5194_v10 }
 0x199   :  { %v3155_v30 = vpop.f32.mrf.mxu0  ;;  %2125 = vmatmul.mubr.f32.gmra.mxu0 %v4327_v50  ;;  %2360 = vmatmul.mubr.f32.gmra.mxu1 %v5195_v1  ;;  %v3190_v38 = vpop.f32.mrf.mxu1 }
 0x19a   :  { %v4644_v9 = vadd.f32 %v3187_v62, %v3155_v30  ;;  %2130 = vmatprep.mubr.f32.mxu0 %v3451_v13  ;;  %2365 = vmatprep.mubr.f32.mxu1 %v3451_v13 }
 0x19b   :  { %v320_v17 = vpop.f32.mrf.mxu0 }
 0x19c   :  { %v4648_v21 = vadd.f32 %v537_v34, %v320_v17 }
 0x19d   :  { %2133 = vmatmul.mubr.f32.gmra.mxu0 %v4355_v29  ;;  %2369 = vmatmul.mubr.f32.gmra.mxu1 %v5196_v36  ;;  %v549_v29 = vpop.f32.mrf.mxu1 }
 0x19e   :  { %2138 = vmatprep.mubr.f32.mxu0 %v3451_v13  ;;  %2374 = vmatprep.mubr.f32.mxu1 %v3451_v13 }
 0x1a1   :  { %v3158_v50 = vpop.f32.mrf.mxu0  ;;  %2141 = vmatmul.mubr.f32.gmra.mxu0 %v4378_v14  ;;  %2378 = vmatmul.mubr.f32.gmra.mxu1 %v5197_v54  ;;  %v3193_v18 = vpop.f32.mrf.mxu1 }
 0x1a2   :  { %v4658_v0 = vadd.f32 %v3190_v38, %v3158_v50  ;;  %2146 = vmatprep.mubr.f32.mxu0 %v3451_v13  ;;  %2383 = vmatprep.mubr.f32.mxu1 %v3451_v13 }
 0x1a3   :  { %v340_v43 = vpop.f32.mrf.mxu0  ;;  %v561_v14 = vpop.f32.mrf.mxu1 }
 0x1a4   :  { %v4662_v31 = vadd.f32 %v549_v29, %v340_v43 }
 0x1a5   :  { %2149 = vmatmul.mubr.f32.gmra.mxu0 %v4400_v23  ;;  %2387 = vmatmul.mubr.f32.gmra.mxu1 %v5198_v58 }
 0x1a6   :  { %2154 = vmatprep.mubr.f32.mxu0 %v3451_v13  ;;  %2392 = vmatprep.mubr.f32.mxu1 %v3451_v13 }
 0x1a9   :  { %v3161_v5 = vpop.f32.mrf.mxu0  ;;  %2157 = vmatmul.mubr.f32.gmra.mxu0 %v4418_v52  ;;  %2396 = vmatmul.mubr.f32.gmra.mxu1 %v5199_v49  ;;  %v3196_v23 = vpop.f32.mrf.mxu1 }
 0x1aa   :  { %v4672_v47 = vadd.f32 %v3193_v18, %v3161_v5  ;;  %2162 = vmatprep.mubr.f32.mxu0 %v3451_v13  ;;  %2401 = vmatprep.mubr.f32.mxu1 %v3451_v13 }
 0x1ab   :  { %v360_v55 = vpop.f32.mrf.mxu0  ;;  %v573_v52 = vpop.f32.mrf.mxu1 }
 0x1ac   :  { %v4676_v33 = vadd.f32 %v561_v14, %v360_v55 }
 0x1ad   :  { %2165 = vmatmul.mubr.f32.gmra.mxu0 %v4440_v57  ;;  %2405 = vmatmul.mubr.f32.gmra.mxu1 %v1693_v37 }
 0x1ae   :  { %2170 = vmatprep.mubr.f32.mxu0 %v3451_v13  ;;  %2410 = vmatprep.mubr.f32.mxu1 %v3451_v13 }
 0x1b1   :  { %v3164_v27 = vpop.f32.mrf.mxu0  ;;  %v3199_v32 = vpop.f32.mrf.mxu1  ;;  %2173 = vmatmul.mubr.f32.gmra.mxu0 %v4456_v28  ;;  %2414 = vmatmul.mubr.f32.gmra.mxu1 %v1704_v45 }
 0x1b2   :  { %v4686_v3 = vadd.f32 %v3196_v23, %v3164_v27  ;;  %2178 = vmatprep.mubr.f32.mxu0 %v3451_v13  ;;  %2725 = vmatprep.mubr.f32.mxu1 %v3451_v13 }
 0x1b3   :  { %v380_v57 = vpop.f32.mrf.mxu0  ;;  %v585_v37 = vpop.f32.mrf.mxu1 }
 0x1b4   :  { %v4690_v48 = vadd.f32 %v573_v52, %v380_v57 }
 0x1b5   :  { %v3242_v51 = vpop.f32.mrf.mxu1  ;;  %2181 = vmatmul.mubr.f32.gmra.mxu0 %v4466_v6  ;;  %2727 = vmatmul.mubr.f32.vlgmr.msra.gmra.mxu1 %v4154_v7 }
 0x1b6   :  { %2186 = vmatprep.mubr.f32.mxu0 %v3451_v13  ;;  %2732 = vmatprep.mubr.f32.mxu1 %v3451_v13 }
 0x1b7   :  { %v853_v28 = vpop.f32.mrf.mxu1 }
 0x1b9   :  { %v3167_v45 = vpop.f32.mrf.mxu0  ;;  %v3245_v26 = vpop.f32.mrf.mxu1  ;;  %2189 = vmatmul.mubr.f32.gmra.mxu0 %v4478_v56  ;;  %2734 = vmatmul.mubr.f32.gmra.mxu1 %v4171_v35 }
 0x1ba   :  { %v4698_v19 = vadd.f32 %v3199_v32, %v3167_v45  ;;  %2532 = vmatprep.mubr.f32.mxu0 %v3451_v13  ;;  %2739 = vmatprep.mubr.f32.mxu1 %v3451_v13 }
 0x1bb   :  { %v400_v6 = vpop.f32.mrf.mxu0  ;;  %v869_v16 = vpop.f32.mrf.mxu1 }
 0x1bc   :  { %v4702_v12 = vadd.f32 %v585_v37, %v400_v6 }
 0x1bd   :  { %v3210_v60 = vpop.f32.mrf.mxu0  ;;  %v3248_v62 = vpop.f32.mrf.mxu1  ;;  %2534 = vmatmul.mubr.f32.vlgmr.msra.gmra.mxu0 %v4154_v7  ;;  %2741 = vmatmul.mubr.f32.gmra.mxu1 %v4192_v46 }
 0x1be   :  { %v679_v56 = vadd.f32 %v3210_v60, %v4538_v61  ;;  %2539 = vmatprep.mubr.f32.mxu0 %v3451_v13  ;;  %2746 = vmatprep.mubr.f32.mxu1 %v3451_v13 }
 0x1bf   :  { %v671_v42 = vpop.f32.mrf.mxu0  ;;  %v885_v10 = vpop.f32.mrf.mxu1 }
 0x1c0   :  { %v672_v30 = vadd.f32 %v671_v42, %v4548_v25  ;;  %v4710_v1 = vadd.f32 %v3242_v51, %v679_v56 }
 0x1c1   :  { %v3213_v34 = vpop.f32.mrf.mxu0  ;;  %v3251_v17 = vpop.f32.mrf.mxu1  ;;  %2541 = vmatmul.mubr.f32.gmra.mxu0 %v4171_v35  ;;  %2748 = vmatmul.mubr.f32.gmra.mxu1 %v4221_v41 }
 0x1c2   :  { %v693_v7 = vadd.f32 %v3213_v34, %v4576_v11  ;;  %2546 = vmatprep.mubr.f32.mxu0 %v3451_v13  ;;  %2753 = vmatprep.mubr.f32.mxu1 %v3451_v13  ;;  %v4717_v61 = vadd.f32 %v853_v28, %v672_v30 }
 0x1c3   :  { %v685_v36 = vpop.f32.mrf.mxu0  ;;  %v901_v38 = vpop.f32.mrf.mxu1 }
 0x1c4   :  { %v686_v25 = vadd.f32 %v685_v36, %v4586_v2  ;;  %v4720_v50 = vadd.f32 %v3245_v26, %v693_v7 }
 0x1c5   :  { %v3216_v54 = vpop.f32.mrf.mxu0  ;;  %v3254_v29 = vpop.f32.mrf.mxu1  ;;  %2548 = vmatmul.mubr.f32.gmra.mxu0 %v4192_v46  ;;  %2755 = vmatmul.mubr.f32.gmra.mxu1 %v4245_v20 }
 0x1c6   :  { %v707_v35 = vadd.f32 %v3216_v54, %v4614_v24  ;;  %2553 = vmatprep.mubr.f32.mxu0 %v3451_v13  ;;  %2760 = vmatprep.mubr.f32.mxu1 %v3451_v13  ;;  %v4727_v11 = vadd.f32 %v869_v16, %v686_v25 }
 0x1c7   :  { %v699_v43 = vpop.f32.mrf.mxu0  ;;  %v917_v18 = vpop.f32.mrf.mxu1 }
 0x1c8   :  { %v700_v2 = vadd.f32 %v699_v43, %v4624_v4  ;;  %v4730_v58 = vadd.f32 %v3248_v62, %v707_v35 }
 0x1c9   :  { %v3219_v14 = vpop.f32.mrf.mxu0  ;;  %v3257_v5 = vpop.f32.mrf.mxu1  ;;  %2555 = vmatmul.mubr.f32.gmra.mxu0 %v4221_v41  ;;  %2762 = vmatmul.mubr.f32.gmra.mxu1 %v4268_v53 }
 0x1ca   :  { %v721_v46 = vadd.f32 %v3219_v14, %v4644_v9  ;;  %2560 = vmatprep.mubr.f32.mxu0 %v3451_v13  ;;  %2767 = vmatprep.mubr.f32.mxu1 %v3451_v13  ;;  %v4737_v24 = vadd.f32 %v885_v10, %v700_v2 }
 0x1cb   :  { %v713_v49 = vpop.f32.mrf.mxu0  ;;  %v933_v23 = vpop.f32.mrf.mxu1 }
 0x1cc   :  { %v714_v4 = vadd.f32 %v713_v49, %v4648_v21  ;;  %v4740_v55 = vadd.f32 %v3251_v17, %v721_v46 }
 0x1cd   :  { %v3222_v52 = vpop.f32.mrf.mxu0  ;;  %v3260_v27 = vpop.f32.mrf.mxu1  ;;  %2562 = vmatmul.mubr.f32.gmra.mxu0 %v4245_v20  ;;  %2769 = vmatmul.mubr.f32.gmra.mxu1 %v4281_v22 }
 0x1ce   :  { %v735_v41 = vadd.f32 %v3222_v52, %v4658_v0  ;;  %2567 = vmatprep.mubr.f32.mxu0 %v3451_v13  ;;  %2774 = vmatprep.mubr.f32.mxu1 %v3451_v13  ;;  %v4747_v9 = vadd.f32 %v901_v38, %v714_v4 }
 0x1cf   :  { %v727_v32 = vpop.f32.mrf.mxu0  ;;  %v949_v57 = vpop.f32.mrf.mxu1 }
 0x1d0   :  { %v728_v21 = vadd.f32 %v727_v32, %v4662_v31  ;;  %v4750_v37 = vadd.f32 %v3254_v29, %v735_v41 }
 0x1d1   :  { %v3225_v51 = vpop.f32.mrf.mxu0  ;;  %v3263_v28 = vpop.f32.mrf.mxu1  ;;  %2569 = vmatmul.mubr.f32.gmra.mxu0 %v4268_v53  ;;  %2776 = vmatmul.mubr.f32.gmra.mxu1 %v4307_v8 }
 0x1d2   :  { %v749_v20 = vadd.f32 %v3225_v51, %v4672_v47  ;;  %2574 = vmatprep.mubr.f32.mxu0 %v3451_v13  ;;  %2781 = vmatprep.mubr.f32.mxu1 %v3451_v13  ;;  %v4757_v0 = vadd.f32 %v917_v18, %v728_v21 }
 0x1d3   :  { %v741_v45 = vpop.f32.mrf.mxu0  ;;  %v965_v26 = vpop.f32.mrf.mxu1 }
 0x1d4   :  { %v742_v31 = vadd.f32 %v741_v45, %v4676_v33  ;;  %v4760_v6 = vadd.f32 %v3257_v5, %v749_v20 }
 0x1d5   :  { %v3228_v16 = vpop.f32.mrf.mxu0  ;;  %v3306_v60 = vpop.f32.mrf.mxu1  ;;  %2576 = vmatmul.mubr.f32.gmra.mxu0 %v4281_v22  ;;  %2783 = vmatmul.mubr.f32.gmra.mxu1 %v4331_v63 }
 0x1d6   :  { %v763_v53 = vadd.f32 %v3228_v16, %v4686_v3  ;;  %2581 = vmatprep.mubr.f32.mxu0 %v3451_v13  ;;  %2788 = vmatprep.mubr.f32.mxu1 %v3451_v13  ;;  %v4767_v47 = vadd.f32 %v933_v23, %v742_v31 }
 0x1d7   :  { %v755_v62 = vpop.f32.mrf.mxu0  ;;  %v1221_v56 = vpop.f32.mrf.mxu1 }
 0x1d8   :  { %v756_v33 = vadd.f32 %v755_v62, %v4690_v48  ;;  %v4770_v42 = vadd.f32 %v3260_v27, %v763_v53 }
 0x1d9   :  { %v3231_v10 = vpop.f32.mrf.mxu0  ;;  %v3309_v30 = vpop.f32.mrf.mxu1  ;;  %2583 = vmatmul.mubr.f32.gmra.mxu0 %v4307_v8  ;;  %2790 = vmatmul.mubr.f32.gmra.mxu1 %v4357_v44  ;;  %v5200_v8 = vld [vmem:[#allocation15_spill] sm:$0xff] }
 0x1da   :  { %v777_v22 = vadd.f32 %v3231_v10, %v4698_v19  ;;  %2588 = vmatprep.mubr.f32.mxu0 %v3451_v13  ;;  %2795 = vmatprep.mubr.f32.mxu1 %v3451_v13  ;;  %v4777_v3 = vadd.f32 %v949_v57, %v756_v33 }
 0x1db   :  { %v769_v34 = vpop.f32.mrf.mxu0  ;;  %v1233_v17 = vpop.f32.mrf.mxu1 }
 0x1dc   :  { %v770_v48 = vadd.f32 %v769_v34, %v4702_v12  ;;  %v4780_v7 = vadd.f32 %v3263_v28, %v777_v22 }
 0x1dd   :  { %v3274_v36 = vpop.f32.mrf.mxu0  ;;  %v3312_v38 = vpop.f32.mrf.mxu1  ;;  %2590 = vmatmul.mubr.f32.gmra.mxu0 %v4331_v63  ;;  %2797 = vmatmul.mubr.f32.gmra.mxu1 %v5200_v8  ;;  %v5201_v63 = vld [vmem:[#allocation16_spill] sm:$0xff] }
 0x1de   :  { %v1063_v19 = vadd.f32 %v3274_v36, %v4710_v1  ;;  %2595 = vmatprep.mubr.f32.mxu0 %v3451_v13  ;;  %2802 = vmatprep.mubr.f32.mxu1 %v3451_v13  ;;  %v4787_v25 = vadd.f32 %v965_v26, %v770_v48 }
 0x1df   :  { %v1056_v54 = vpop.f32.mrf.mxu0  ;;  %v1245_v29 = vpop.f32.mrf.mxu1 }
 0x1e0   :  { %v4789_v35 = vadd.f32 %v3306_v60, %v1063_v19  ;;  %v1057_v12 = vadd.f32 %v1056_v54, %v4717_v61 }
 0x1e1   :  { %v3277_v43 = vpop.f32.mrf.mxu0  ;;  %v3315_v18 = vpop.f32.mrf.mxu1  ;;  %2597 = vmatmul.mubr.f32.gmra.mxu0 %v4357_v44  ;;  %2804 = vmatmul.mubr.f32.gmra.mxu1 %v5201_v63 }
 0x1e2   :  { %v4794_v2 = vadd.f32 %v1221_v56, %v1057_v12  ;;  %v1075_v1 = vadd.f32 %v3277_v43, %v4720_v50  ;;  %2602 = vmatprep.mubr.f32.mxu0 %v3451_v13  ;;  %2809 = vmatprep.mubr.f32.mxu1 %v3451_v13 }
 0x1e3   :  { %v1068_v14 = vpop.f32.mrf.mxu0  ;;  %v1257_v5 = vpop.f32.mrf.mxu1 }
 0x1e4   :  { %v4799_v46 = vadd.f32 %v3309_v30, %v1075_v1  ;;  %v1069_v61 = vadd.f32 %v1068_v14, %v4727_v11 }
 0x1e5   :  { %v3280_v49 = vpop.f32.mrf.mxu0  ;;  %v3318_v23 = vpop.f32.mrf.mxu1  ;;  %2604 = vmatmul.mubr.f32.gmra.mxu0 %v5200_v8  ;;  %2811 = vmatmul.mubr.f32.gmra.mxu1 %v4423_v15 }
 0x1e6   :  { %v4804_v44 = vadd.f32 %v1233_v17, %v1069_v61  ;;  %v1087_v50 = vadd.f32 %v3280_v49, %v4730_v58  ;;  %2609 = vmatprep.mubr.f32.mxu0 %v3451_v13  ;;  %2816 = vmatprep.mubr.f32.mxu1 %v3451_v13 }
 0x1e7   :  { %v1080_v4 = vpop.f32.mrf.mxu0  ;;  %v1269_v52 = vpop.f32.mrf.mxu1 }
 0x1e8   :  { %v4809_v27 = vadd.f32 %v3312_v38, %v1087_v50  ;;  %v1081_v11 = vadd.f32 %v1080_v4, %v4737_v24 }
 0x1e9   :  { %v3283_v41 = vpop.f32.mrf.mxu0  ;;  %v3321_v32 = vpop.f32.mrf.mxu1  ;;  %2611 = vmatmul.mubr.f32.gmra.mxu0 %v5201_v63  ;;  %2818 = vmatmul.mubr.f32.gmra.mxu1 %v4442_v40 }
 0x1ea   :  { %v4814_v57 = vadd.f32 %v1245_v29, %v1081_v11  ;;  %v1099_v58 = vadd.f32 %v3283_v41, %v4740_v55  ;;  %2616 = vmatprep.mubr.f32.mxu0 %v3451_v13  ;;  %2823 = vmatprep.mubr.f32.mxu1 %v3451_v13 }
 0x1eb   :  { %v1092_v21 = vpop.f32.mrf.mxu0  ;;  %v1281_v51 = vpop.f32.mrf.mxu1 }
 0x1ec   :  { %v4819_v28 = vadd.f32 %v3315_v18, %v1099_v58  ;;  %v1093_v24 = vadd.f32 %v1092_v21, %v4747_v9 }
 0x1ed   :  { %v3286_v20 = vpop.f32.mrf.mxu0  ;;  %v3324_v45 = vpop.f32.mrf.mxu1  ;;  %2618 = vmatmul.mubr.f32.gmra.mxu0 %v4423_v15  ;;  %2825 = vmatmul.mubr.f32.gmra.mxu1 %v4458_v59 }
 0x1ee   :  { %v4824_v26 = vadd.f32 %v1257_v5, %v1093_v24  ;;  %v1111_v55 = vadd.f32 %v3286_v20, %v4750_v37  ;;  %2623 = vmatprep.mubr.f32.mxu0 %v3451_v13  ;;  %2830 = vmatprep.mubr.f32.mxu1 %v3451_v13 }
 0x1ef   :  { %v1104_v31 = vpop.f32.mrf.mxu0  ;;  %v1293_v16 = vpop.f32.mrf.mxu1 }
 0x1f0   :  { %v4829_v60 = vadd.f32 %v3318_v23, %v1111_v55  ;;  %v1105_v9 = vadd.f32 %v1104_v31, %v4757_v0 }
 0x1f1   :  { %v3289_v53 = vpop.f32.mrf.mxu0  ;;  %v3327_v62 = vpop.f32.mrf.mxu1  ;;  %2625 = vmatmul.mubr.f32.gmra.mxu0 %v4442_v40  ;;  %2832 = vmatmul.mubr.f32.gmra.mxu1 %v4468_v39 }
 0x1f2   :  { %v4834_v15 = vadd.f32 %v1269_v52, %v1105_v9  ;;  %v1123_v37 = vadd.f32 %v3289_v53, %v4760_v6  ;;  %2630 = vmatprep.mubr.f32.mxu0 %v3451_v13 }
 0x1f3   :  { %v1116_v56 = vpop.f32.mrf.mxu0  ;;  %v1305_v33 = vpop.f32.mrf.mxu1 }
 0x1f4   :  { %v4838_v10 = vadd.f32 %v3321_v32, %v1123_v37  ;;  %v1117_v30 = vadd.f32 %v1116_v56, %v4767_v47 }
 0x1f5   :  { %v3292_v22 = vpop.f32.mrf.mxu0  ;;  %v1860_v0 = vpop.f32.mrf.mxu1  ;;  %2632 = vmatmul.mubr.f32.gmra.mxu0 %v4458_v59 }
 0x1f6   :  { %v4842_v34 = vadd.f32 %v1281_v51, %v1117_v30  ;;  %v1135_v40 = vadd.f32 %v3292_v22, %v4770_v42  ;;  %2637 = vmatprep.mubr.f32.mxu0 %v3451_v13 }
 0x1f7   :  { %v1128_v17 = vpop.f32.mrf.mxu0  ;;  %v1862_v6 = vpop.f32.mrf.mxu1 }
 0x1f8   :  { %v4846_v48 = vadd.f32 %v3324_v45, %v1135_v40  ;;  %v1129_v36 = vadd.f32 %v1128_v17, %v4777_v3 }
 0x1f9   :  { %v3295_v38 = vpop.f32.mrf.mxu0  ;;  %v1867_v8 = vpop.f32.mrf.mxu1  ;;  %2639 = vmatmul.mubr.f32.gmra.mxu0 %v4468_v39 }
 0x1fa   :  { %5202 = vst [vmem:[#allocation15_spill] sm:$0xff] %v4846_v48  ;;  %v4850_v47 = vadd.f32 %v1293_v16, %v1129_v36  ;;  %v1147_v59 = vadd.f32 %v3295_v38, %v4780_v7 }
 0x1fb   :  { %v1140_v19 = vpop.f32.mrf.mxu0  ;;  %v1869_v54 = vpop.f32.mrf.mxu1 }
 0x1fc   :  { %5203 = vst [vmem:[#allocation16_spill] sm:$0xff] %v4850_v47  ;;  %v4853_v29 = vadd.f32 %v3327_v62, %v1147_v59  ;;  %v1141_v13 = vadd.f32 %v1140_v19, %v4787_v25 }
 0x1fd   :  { %v1543_v42 = vpop.f32.mrf.mxu0  ;;  %v1874_v12 = vpop.f32.mrf.mxu1 }
 0x1fe   :  { %5204 = vst [vmem:[#allocation17_spill] sm:$0xff] %v4853_v29  ;;  %v4856_v43 = vadd.f32 %v1305_v33, %v1141_v13  ;;  %v4858_v18 = vadd.f32 %v1860_v0, %v1543_v42 }
 0x1ff   :  { %v1545_v3 = vpop.f32.mrf.mxu0  ;;  %v1876_v63 = vpop.f32.mrf.mxu1 }
 0x200   :  { %5205 = vst [vmem:[#allocation18_spill] sm:$0xff] %v4856_v43  ;;  %v4860_v1 = vadd.f32 %v1862_v6, %v1545_v3 }
 0x201   :  { %v1554_v39 = vpop.f32.mrf.mxu0  ;;  %v1881_v14 = vpop.f32.mrf.mxu1 }
 0x202   :  { %v4862_v5 = vadd.f32 %v1867_v8, %v1554_v39 }
 0x203   :  { %v1556_v7 = vpop.f32.mrf.mxu0  ;;  %v1883_v61 = vpop.f32.mrf.mxu1 }
 0x204   :  { %v4864_v49 = vadd.f32 %v1869_v54, %v1556_v7 }
 0x205   :  { %v1565_v23 = vpop.f32.mrf.mxu0  ;;  %v1888_v25 = vpop.f32.mrf.mxu1 }
 0x206   :  { %v4866_v50 = vadd.f32 %v1874_v12, %v1565_v23 }
 0x207   :  { %v1567_v4 = vpop.f32.mrf.mxu0  ;;  %v1890_v52 = vpop.f32.mrf.mxu1 }
 0x208   :  { %v4868_v11 = vadd.f32 %v1876_v63, %v1567_v4 }
 0x209   :  { %v1576_v41 = vpop.f32.mrf.mxu0  ;;  %v1895_v32 = vpop.f32.mrf.mxu1 }
 0x20a   :  { %v4870_v58 = vadd.f32 %v1881_v14, %v1576_v41 }
 0x20b   :  { %v1578_v21 = vpop.f32.mrf.mxu0  ;;  %v1897_v51 = vpop.f32.mrf.mxu1 }
 0x20c   :  { %v4872_v24 = vadd.f32 %v1883_v61, %v1578_v21 }
 0x20d   :  { %v1587_v20 = vpop.f32.mrf.mxu0  ;;  %v1902_v45 = vpop.f32.mrf.mxu1 }
 0x20e   :  { %v4874_v55 = vadd.f32 %v1888_v25, %v1587_v20 }
 0x20f   :  { %v1589_v31 = vpop.f32.mrf.mxu0  ;;  %v1904_v16 = vpop.f32.mrf.mxu1 }
 0x210   :  { %v4876_v9 = vadd.f32 %v1890_v52, %v1589_v31 }
 0x211   :  { %v1598_v53 = vpop.f32.mrf.mxu0  ;;  %v1909_v62 = vpop.f32.mrf.mxu1 }
 0x212   :  { %v4878_v37 = vadd.f32 %v1895_v32, %v1598_v53 }
 0x213   :  { %v1600_v56 = vpop.f32.mrf.mxu0  ;;  %v1911_v33 = vpop.f32.mrf.mxu1 }
 0x214   :  { %v4880_v30 = vadd.f32 %v1897_v51, %v1600_v56 }
 0x215   :  { %v1609_v22 = vpop.f32.mrf.mxu0  ;;  %v1916_v0 = vpop.f32.mrf.mxu1 }
 0x216   :  { %v4882_v40 = vadd.f32 %v1902_v45, %v1609_v22 }
 0x217   :  { %v1611_v17 = vpop.f32.mrf.mxu0  ;;  %v1918_v6 = vpop.f32.mrf.mxu1 }
 0x218   :  { %v4884_v36 = vadd.f32 %v1904_v16, %v1611_v17 }
 0x219   :  { %v1620_v38 = vpop.f32.mrf.mxu0  ;;  %v1923_v8 = vpop.f32.mrf.mxu1 }
 0x21a   :  { %v4886_v59 = vadd.f32 %v1909_v62, %v1620_v38 }
 0x21b   :  { %v1622_v19 = vpop.f32.mrf.mxu0  ;;  %v1925_v54 = vpop.f32.mrf.mxu1 }
 0x21c   :  { %v4888_v13 = vadd.f32 %v1911_v33, %v1622_v19 }
 0x21d   :  { %v1631_v42 = vpop.f32.mrf.mxu0  ;;  %v1930_v12 = vpop.f32.mrf.mxu1 }
 0x21e   :  { %v4890_v3 = vadd.f32 %v1916_v0, %v1631_v42 }
 0x21f   :  { %v1633_v63 = vpop.f32.mrf.mxu0  ;;  %v1932_v39 = vpop.f32.mrf.mxu1 }
 0x220   :  { %v4892_v14 = vadd.f32 %v1918_v6, %v1633_v63 }
 0x221   :  { %v1642_v7 = vpop.f32.mrf.mxu0  ;;  %v1937_v61 = vpop.f32.mrf.mxu1 }
 0x222   :  { %v4894_v23 = vadd.f32 %v1923_v8, %v1642_v7 }
 0x223   :  { %v1644_v25 = vpop.f32.mrf.mxu0  ;;  %v1939_v4 = vpop.f32.mrf.mxu1 }
 0x224   :  { %v4896_v52 = vadd.f32 %v1925_v54, %v1644_v25 }
 0x225   :  { %v1653_v41 = vpop.f32.mrf.mxu0  ;;  %v1944_v32 = vpop.f32.mrf.mxu1 }
 0x226   :  { %v4898_v21 = vadd.f32 %v1930_v12, %v1653_v41 }
 0x227   :  { %v1655_v51 = vpop.f32.mrf.mxu0  ;;  %v1946_v20 = vpop.f32.mrf.mxu1 }
 0x228   :  { %v4900_v45 = vadd.f32 %v1932_v39, %v1655_v51 }
 0x229   :  { %v1664_v31 = vpop.f32.mrf.mxu0  ;;  %v1951_v16 = vpop.f32.mrf.mxu1 }
 0x22a   :  { %v4902_v53 = vadd.f32 %v1937_v61, %v1664_v31 }
 0x22b   :  { %v1666_v62 = vpop.f32.mrf.mxu0  ;;  %v1953_v56 = vpop.f32.mrf.mxu1 }
 0x22c   :  { %v4904_v33 = vadd.f32 %v1939_v4, %v1666_v62 }
 0x22d   :  { %v1675_v22 = vpop.f32.mrf.mxu0  ;;  %v1958_v0 = vpop.f32.mrf.mxu1 }
 0x22e   :  { %v4906_v17 = vadd.f32 %v1944_v32, %v1675_v22 }
 0x22f   :  { %v1677_v6 = vpop.f32.mrf.mxu0  ;;  %v1960_v38 = vpop.f32.mrf.mxu1 }
 0x230   :  { %v4908_v8 = vadd.f32 %v1946_v20, %v1677_v6 }
 0x231   :  { %v1686_v19 = vpop.f32.mrf.mxu0  ;;  %v1965_v54 = vpop.f32.mrf.mxu1 }
 0x232   :  { %v4910_v42 = vadd.f32 %v1951_v16, %v1686_v19 }
 0x233   :  { %v1688_v12 = vpop.f32.mrf.mxu0  ;;  %v1967_v63 = vpop.f32.mrf.mxu1 }
 0x234   :  { %v4912_v39 = vadd.f32 %v1953_v56, %v1688_v12 }
 0x235   :  { %v1697_v7 = vpop.f32.mrf.mxu0  ;;  %v2280_v61 = vpop.f32.mrf.mxu1 }
 0x236   :  { %v4914_v25 = vadd.f32 %v1958_v0, %v1697_v7 }
 0x237   :  { %v1699_v4 = vpop.f32.mrf.mxu0  ;;  %v2282_v41 = vpop.f32.mrf.mxu1 }
 0x238   :  { %v4916_v32 = vadd.f32 %v1960_v38, %v1699_v4 }
 0x239   :  { %v1708_v51 = vpop.f32.mrf.mxu0  ;;  %v2289_v31 = vpop.f32.mrf.mxu1 }
 0x23a   :  { %v4918_v20 = vadd.f32 %v1965_v54, %v1708_v51 }
 0x23b   :  { %v1710_v62 = vpop.f32.mrf.mxu0  ;;  %v2291_v22 = vpop.f32.mrf.mxu1 }
 0x23c   :  { %5206 = vst [vmem:[#allocation19_spill] sm:$0xff] %v4918_v20  ;;  %v4920_v16 = vadd.f32 %v1967_v63, %v1710_v62 }
 0x23d   :  { %v2070_v6 = vpop.f32.mrf.mxu0  ;;  %v2298_v19 = vpop.f32.mrf.mxu1 }
 0x23e   :  { %5207 = vst [vmem:[#allocation20_spill] sm:$0xff] %v4920_v16  ;;  %v2071_v56 = vadd.f32 %v2070_v6, %v4858_v18 }
 0x23f   :  { %v2072_v12 = vpop.f32.mrf.mxu0  ;;  %v2300_v29 = vpop.f32.mrf.mxu1 }
 0x240   :  { %v2073_v0 = vadd.f32 %v2072_v12, %v4860_v1  ;;  %v4924_v7 = vadd.f32 %v2280_v61, %v2071_v56 }
 0x241   :  { %v2078_v38 = vpop.f32.mrf.mxu0  ;;  %v2307_v4 = vpop.f32.mrf.mxu1 }
 0x242   :  { %v2079_v43 = vadd.f32 %v2078_v38, %v4862_v5  ;;  %v4927_v54 = vadd.f32 %v2282_v41, %v2073_v0 }
 0x243   :  { %v2080_v51 = vpop.f32.mrf.mxu0  ;;  %v2309_v48 = vpop.f32.mrf.mxu1 }
 0x244   :  { %v2081_v63 = vadd.f32 %v2080_v51, %v4864_v49  ;;  %v4930_v62 = vadd.f32 %v2289_v31, %v2079_v43 }
 0x245   :  { %v2086_v16 = vpop.f32.mrf.mxu0  ;;  %v2316_v18 = vpop.f32.mrf.mxu1 }
 0x246   :  { %v2087_v6 = vadd.f32 %v2086_v16, %v4866_v50  ;;  %v4933_v20 = vadd.f32 %v2291_v22, %v2081_v63 }
 0x247   :  { %v2088_v1 = vpop.f32.mrf.mxu0  ;;  %v2318_v61 = vpop.f32.mrf.mxu1 }
 0x248   :  { %v2089_v56 = vadd.f32 %v2088_v1, %v4868_v11  ;;  %v4936_v12 = vadd.f32 %v2298_v19, %v2087_v6 }
 0x249   :  { %v2094_v5 = vpop.f32.mrf.mxu0  ;;  %v2325_v41 = vpop.f32.mrf.mxu1 }
 0x24a   :  { %v2095_v0 = vadd.f32 %v2094_v5, %v4870_v58  ;;  %v4939_v38 = vadd.f32 %v2300_v29, %v2089_v56 }
 0x24b   :  { %v2096_v43 = vpop.f32.mrf.mxu0  ;;  %v2327_v49 = vpop.f32.mrf.mxu1 }
 0x24c   :  { %v2097_v31 = vadd.f32 %v2096_v43, %v4872_v24  ;;  %v4942_v51 = vadd.f32 %v2307_v4, %v2095_v0 }
 0x24d   :  { %v2102_v50 = vpop.f32.mrf.mxu0  ;;  %v2334_v22 = vpop.f32.mrf.mxu1 }
 0x24e   :  { %v2103_v16 = vadd.f32 %v2102_v50, %v4874_v55  ;;  %v4945_v63 = vadd.f32 %v2309_v48, %v2097_v31 }
 0x24f   :  { %v2104_v11 = vpop.f32.mrf.mxu0  ;;  %v2336_v19 = vpop.f32.mrf.mxu1 }
 0x250   :  { %v2105_v6 = vadd.f32 %v2104_v11, %v4876_v9  ;;  %v4948_v1 = vadd.f32 %v2316_v18, %v2103_v16 }
 0x251   :  { %v2110_v29 = vpop.f32.mrf.mxu0  ;;  %v2343_v58 = vpop.f32.mrf.mxu1 }
 0x252   :  { %v2111_v56 = vadd.f32 %v2110_v29, %v4878_v37  ;;  %v4951_v5 = vadd.f32 %v2318_v61, %v2105_v6 }
 0x253   :  { %v2112_v24 = vpop.f32.mrf.mxu0  ;;  %v2345_v4 = vpop.f32.mrf.mxu1 }
 0x254   :  { %v2113_v0 = vadd.f32 %v2112_v24, %v4880_v30  ;;  %v4954_v43 = vadd.f32 %v2325_v41, %v2111_v56 }
 0x255   :  { %v2118_v48 = vpop.f32.mrf.mxu0  ;;  %v2352_v55 = vpop.f32.mrf.mxu1 }
 0x256   :  { %v2119_v31 = vadd.f32 %v2118_v48, %v4882_v40  ;;  %v4957_v50 = vadd.f32 %v2327_v49, %v2113_v0 }
 0x257   :  { %v2120_v9 = vpop.f32.mrf.mxu0  ;;  %v2354_v18 = vpop.f32.mrf.mxu1 }
 0x258   :  { %v2121_v16 = vadd.f32 %v2120_v9, %v4884_v36  ;;  %v4960_v11 = vadd.f32 %v2334_v22, %v2119_v31 }
 0x259   :  { %v2126_v37 = vpop.f32.mrf.mxu0  ;;  %v2361_v61 = vpop.f32.mrf.mxu1 }
 0x25a   :  { %v2127_v6 = vadd.f32 %v2126_v37, %v4886_v59  ;;  %v4963_v29 = vadd.f32 %v2336_v19, %v2121_v16 }
 0x25b   :  { %v2128_v30 = vpop.f32.mrf.mxu0  ;;  %v2363_v41 = vpop.f32.mrf.mxu1 }
 0x25c   :  { %v2129_v56 = vadd.f32 %v2128_v30, %v4888_v13  ;;  %v4966_v24 = vadd.f32 %v2343_v58, %v2127_v6 }
 0x25d   :  { %v2134_v40 = vpop.f32.mrf.mxu0  ;;  %v2370_v49 = vpop.f32.mrf.mxu1 }
 0x25e   :  { %v2135_v0 = vadd.f32 %v2134_v40, %v4890_v3  ;;  %v4969_v48 = vadd.f32 %v2345_v4, %v2129_v56 }
 0x25f   :  { %v2136_v36 = vpop.f32.mrf.mxu0  ;;  %v2372_v22 = vpop.f32.mrf.mxu1 }
 0x260   :  { %v2137_v31 = vadd.f32 %v2136_v36, %v4892_v14  ;;  %v4972_v9 = vadd.f32 %v2352_v55, %v2135_v0 }
 0x261   :  { %v2142_v59 = vpop.f32.mrf.mxu0  ;;  %v2379_v19 = vpop.f32.mrf.mxu1 }
 0x262   :  { %v2143_v16 = vadd.f32 %v2142_v59, %v4894_v23  ;;  %v4975_v37 = vadd.f32 %v2354_v18, %v2137_v31 }
 0x263   :  { %v2144_v13 = vpop.f32.mrf.mxu0  ;;  %v2381_v58 = vpop.f32.mrf.mxu1 }
 0x264   :  { %v2145_v6 = vadd.f32 %v2144_v13, %v4896_v52  ;;  %v4978_v30 = vadd.f32 %v2361_v61, %v2143_v16 }
 0x265   :  { %v2150_v3 = vpop.f32.mrf.mxu0  ;;  %v2388_v4 = vpop.f32.mrf.mxu1 }
 0x266   :  { %v2151_v56 = vadd.f32 %v2150_v3, %v4898_v21  ;;  %v4981_v40 = vadd.f32 %v2363_v41, %v2145_v6 }
 0x267   :  { %v2152_v14 = vpop.f32.mrf.mxu0  ;;  %v2390_v55 = vpop.f32.mrf.mxu1 }
 0x268   :  { %v2153_v0 = vadd.f32 %v2152_v14, %v4900_v45  ;;  %v4984_v36 = vadd.f32 %v2370_v49, %v2151_v56 }
 0x269   :  { %v2158_v23 = vpop.f32.mrf.mxu0  ;;  %v2397_v18 = vpop.f32.mrf.mxu1 }
 0x26a   :  { %v2159_v31 = vadd.f32 %v2158_v23, %v4902_v53  ;;  %v4987_v59 = vadd.f32 %v2372_v22, %v2153_v0 }
 0x26b   :  { %v2160_v52 = vpop.f32.mrf.mxu0  ;;  %v2399_v61 = vpop.f32.mrf.mxu1 }
 0x26c   :  { %v2161_v16 = vadd.f32 %v2160_v52, %v4904_v33  ;;  %v4990_v13 = vadd.f32 %v2379_v19, %v2159_v31 }
 0x26d   :  { %v2166_v21 = vpop.f32.mrf.mxu0  ;;  %v4992_v41 = vpop.f32.mrf.mxu1 }
 0x26e   :  { %5208 = vst [vmem:[#allocation21_spill] sm:$0xff] %v4992_v41  ;;  %v2167_v6 = vadd.f32 %v2166_v21, %v4906_v17  ;;  %v4995_v45 = vadd.f32 %v2381_v58, %v2161_v16 }
 0x26f   :  { %v2168_v49 = vpop.f32.mrf.mxu0  ;;  %v4997_v3 = vpop.f32.mrf.mxu1 }
 0x270   :  { %5209 = vst [vmem:[#allocation22_spill] sm:$0xff] %v4997_v3  ;;  %v2169_v53 = vadd.f32 %v2168_v49, %v4908_v8  ;;  %v5000_v22 = vadd.f32 %v2388_v4, %v2167_v6 }
 0x271   :  { %v2174_v56 = vpop.f32.mrf.mxu0  ;;  %v5002_v14 = vpop.f32.mrf.mxu1 }
 0x272   :  { %5210 = vst [vmem:[#allocation23_spill] sm:$0xff] %v5002_v14  ;;  %v2175_v33 = vadd.f32 %v2174_v56, %v4910_v42  ;;  %v5005_v19 = vadd.f32 %v2390_v55, %v2169_v53 }
 0x273   :  { %v2176_v0 = vpop.f32.mrf.mxu0  ;;  %v5007_v23 = vpop.f32.mrf.mxu1 }
 0x274   :  { %5211 = vst [vmem:[#allocation24_spill] sm:$0xff] %v5007_v23  ;;  %v2177_v17 = vadd.f32 %v2176_v0, %v4912_v39  ;;  %v5010_v58 = vadd.f32 %v2397_v18, %v2175_v33 }
 0x275   :  { %v5012_v31 = vpop.f32.mrf.mxu0  ;;  %v2728_v52 = vpop.f32.mrf.mxu1 }
 0x276   :  { %5212 = vst [vmem:[#allocation25_spill] sm:$0xff] %v5010_v58  ;;  %v5014_v8 = vadd.f32 %v2399_v61, %v2177_v17 }
 0x277   :  { %v5016_v4 = vpop.f32.mrf.mxu0  ;;  %v2730_v16 = vpop.f32.mrf.mxu1 }
 0x278   :  { %5213 = vst [vmem:[#allocation26_spill] sm:$0xff] %v5014_v8 }
 0x279   :  { %v5018_v21 = vpop.f32.mrf.mxu0  ;;  %v2735_v42 = vpop.f32.mrf.mxu1 }
 0x27a   :  { %5214 = vst [vmem:[#allocation27_spill] sm:$0xff] %v5018_v21 }
 0x27b   :  { %v5020_v55 = vpop.f32.mrf.mxu0  ;;  %v2737_v6 = vpop.f32.mrf.mxu1 }
 0x27c   :  { %5215 = vst [vmem:[#allocation28_spill] sm:$0xff] %v5020_v55 }
 0x27d   :  { %v2535_v49 = vpop.f32.mrf.mxu0  ;;  %v2742_v53 = vpop.f32.mrf.mxu1 }
 0x27e   :  { %v2536_v39 = vadd.f32 %v2535_v49, %v4924_v7 }
 0x27f   :  { %v2537_v18 = vpop.f32.mrf.mxu0  ;;  %v2744_v56 = vpop.f32.mrf.mxu1 }
 0x280   :  { %v2729_v33 = vadd.f32 %v2728_v52, %v2536_v39  ;;  %v2538_v0 = vadd.f32 %v2537_v18, %v4927_v54 }
 0x281   :  { %v2542_v61 = vpop.f32.mrf.mxu0  ;;  %v2749_v17 = vpop.f32.mrf.mxu1 }
 0x282   :  { %v2838_v23 = vmul.f32 %v2729_v33, %v4794_v2  ;;  %v2731_v14 = vadd.f32 %v2730_v16, %v2538_v0  ;;  %v2543_v3 = vadd.f32 %v2542_v61, %v4930_v62 }
 0x283   :  { %v2544_v8 = vpop.f32.mrf.mxu0  ;;  %v2751_v41 = vpop.f32.mrf.mxu1 }
 0x284   :  { %v2880_v55 = vmul.f32 %v2731_v14, %v4794_v2  ;;  %v2736_v21 = vadd.f32 %v2735_v42, %v2543_v3  ;;  %v2545_v58 = vadd.f32 %v2544_v8, %v4933_v20 }
 0x285   :  { %v2549_v7 = vpop.f32.mrf.mxu0  ;;  %v2756_v49 = vpop.f32.mrf.mxu1 }
 0x286   :  { %v2839_v52 = vmul.f32 %v2736_v21, %v4789_v35  ;;  %v2738_v39 = vadd.f32 %v2737_v6, %v2545_v58  ;;  %v2550_v54 = vadd.f32 %v2549_v7, %v4936_v12 }
 0x287   :  { %v2551_v18 = vpop.f32.mrf.mxu0  ;;  %v2758_v47 = vpop.f32.mrf.mxu1 }
 0x288   :  { %v2854_v33 = vadd.f32 %v2839_v52, %v2838_v23  ;;  %v2881_v16 = vmul.f32 %v2738_v39, %v4789_v35  ;;  %v2743_v62 = vadd.f32 %v2742_v53, %v2550_v54  ;;  %v2552_v0 = vadd.f32 %v2551_v18, %v4939_v38 }
 0x289   :  { %v2556_v61 = vpop.f32.mrf.mxu0  ;;  %v2763_v2 = vpop.f32.mrf.mxu1 }
 0x28a   :  { %v2896_v3 = vadd.f32 %v2881_v16, %v2880_v55  ;;  %v2840_v20 = vmul.f32 %v2743_v62, %v4804_v44  ;;  %v2745_v14 = vadd.f32 %v2744_v56, %v2552_v0  ;;  %v2557_v8 = vadd.f32 %v2556_v61, %v4942_v51 }
 0x28b   :  { %v2558_v21 = vpop.f32.mrf.mxu0  ;;  %v2765_v58 = vpop.f32.mrf.mxu1 }
 0x28c   :  { %v2855_v42 = vadd.f32 %v2854_v33, %v2840_v20  ;;  %v2882_v12 = vmul.f32 %v2745_v14, %v4804_v44  ;;  %v2750_v6 = vadd.f32 %v2749_v17, %v2557_v8  ;;  %v2559_v23 = vadd.f32 %v2558_v21, %v4945_v63 }
 0x28d   :  { %v2563_v35 = vpop.f32.mrf.mxu0  ;;  %v2770_v53 = vpop.f32.mrf.mxu1 }
 0x28e   :  { %v2897_v7 = vadd.f32 %v2896_v3, %v2882_v12  ;;  %v2841_v38 = vmul.f32 %v2750_v6, %v4799_v46  ;;  %v2752_v52 = vadd.f32 %v2751_v41, %v2559_v23  ;;  %v2564_v55 = vadd.f32 %v2563_v35, %v4948_v1 }
 0x28f   :  { %v2565_v39 = vpop.f32.mrf.mxu0  ;;  %v2772_v56 = vpop.f32.mrf.mxu1 }
 0x290   :  { %v2856_v54 = vadd.f32 %v2855_v42, %v2841_v38  ;;  %v2883_v51 = vmul.f32 %v2752_v52, %v4799_v46  ;;  %v2757_v18 = vadd.f32 %v2756_v49, %v2564_v55  ;;  %v2566_v33 = vadd.f32 %v2565_v39, %v4951_v5 }
 0x291   :  { %v2570_v44 = vpop.f32.mrf.mxu0  ;;  %v2777_v17 = vpop.f32.mrf.mxu1 }
 0x292   :  { %v2898_v16 = vadd.f32 %v2897_v7, %v2883_v51  ;;  %v2842_v63 = vmul.f32 %v2757_v18, %v4814_v57  ;;  %v2759_v62 = vadd.f32 %v2758_v47, %v2566_v33  ;;  %v2571_v0 = vadd.f32 %v2570_v44, %v4954_v43 }
 0x293   :  { %v2572_v61 = vpop.f32.mrf.mxu0  ;;  %v2779_v41 = vpop.f32.mrf.mxu1 }
 0x294   :  { %v2857_v3 = vadd.f32 %v2856_v54, %v2842_v63  ;;  %v2884_v1 = vmul.f32 %v2759_v62, %v4814_v57  ;;  %v2764_v20 = vadd.f32 %v2763_v2, %v2571_v0  ;;  %v2573_v14 = vadd.f32 %v2572_v61, %v4957_v50 }
 0x295   :  { %v2577_v46 = vpop.f32.mrf.mxu0  ;;  %v2784_v49 = vpop.f32.mrf.mxu1 }
 0x296   :  { %v2899_v8 = vadd.f32 %v2898_v16, %v2884_v1  ;;  %v2843_v5 = vmul.f32 %v2764_v20, %v4809_v27  ;;  %v2766_v21 = vadd.f32 %v2765_v58, %v2573_v14  ;;  %v2578_v42 = vadd.f32 %v2577_v46, %v4960_v11 }
 0x297   :  { %v2579_v12 = vpop.f32.mrf.mxu0  ;;  %v2786_v47 = vpop.f32.mrf.mxu1 }
 0x298   :  { %v2858_v6 = vadd.f32 %v2857_v3, %v2843_v5  ;;  %v2885_v43 = vmul.f32 %v2766_v21, %v4809_v27  ;;  %v2771_v23 = vadd.f32 %v2770_v53, %v2578_v42  ;;  %v2580_v35 = vadd.f32 %v2579_v12, %v4963_v29 }
 0x299   :  { %v2584_v57 = vpop.f32.mrf.mxu0  ;;  %v2791_v2 = vpop.f32.mrf.mxu1 }
 0x29a   :  { %v2900_v7 = vadd.f32 %v2899_v8, %v2885_v43  ;;  %v2844_v50 = vmul.f32 %v2771_v23, %v4824_v26  ;;  %v2773_v38 = vadd.f32 %v2772_v56, %v2580_v35  ;;  %v2585_v52 = vadd.f32 %v2584_v57, %v4966_v24 }
 0x29b   :  { %v2586_v55 = vpop.f32.mrf.mxu0  ;;  %v2793_v58 = vpop.f32.mrf.mxu1 }
 0x29c   :  { %v2859_v39 = vadd.f32 %v2858_v6, %v2844_v50  ;;  %v2886_v11 = vmul.f32 %v2773_v38, %v4824_v26  ;;  %v2778_v54 = vadd.f32 %v2777_v17, %v2585_v52  ;;  %v2587_v51 = vadd.f32 %v2586_v55, %v4969_v48 }
 0x29d   :  { %v2591_v27 = vpop.f32.mrf.mxu0  ;;  %v2798_v53 = vpop.f32.mrf.mxu1 }
 0x29e   :  { %v2901_v18 = vadd.f32 %v2900_v7, %v2886_v11  ;;  %v2845_v29 = vmul.f32 %v2778_v54, %v4819_v28  ;;  %v2780_v33 = vadd.f32 %v2779_v41, %v2587_v51  ;;  %v2592_v44 = vadd.f32 %v2591_v27, %v4972_v9 }
 0x29f   :  { %v2593_v16 = vpop.f32.mrf.mxu0  ;;  %v2800_v56 = vpop.f32.mrf.mxu1  ;;  %v2183_v51 = vadd.f32 %v5012_v31, %v4914_v25  ;;  %v5219_v25 = vld [vmem:[#allocation27_spill] sm:$0xff] }
 0x2a0   :  { %v2860_v63 = vadd.f32 %v2859_v39, %v2845_v29  ;;  %v2887_v24 = vmul.f32 %v2780_v33, %v4819_v28  ;;  %v2785_v62 = vadd.f32 %v2784_v49, %v2592_v44  ;;  %v2594_v0 = vadd.f32 %v2593_v16, %v4975_v37  ;;  %v5216_v16 = vld [vmem:[#allocation16_spill] sm:$0xff] }
 0x2a1   :  { %v2598_v26 = vpop.f32.mrf.mxu0  ;;  %v2805_v17 = vpop.f32.mrf.mxu1 }
 0x2a2   :  { %v2902_v61 = vadd.f32 %v2901_v18, %v2887_v24  ;;  %v2846_v48 = vmul.f32 %v2785_v62, %v4834_v15  ;;  %v2787_v3 = vadd.f32 %v2786_v47, %v2594_v0  ;;  %v2599_v1 = vadd.f32 %v2598_v26, %v4978_v30  ;;  %v5218_v62 = vld [vmem:[#allocation19_spill] sm:$0xff]  ;;  %v5220_v26 = vld [vmem:[#allocation21_spill] sm:$0xff] }
 0x2a3   :  { %v2600_v20 = vpop.f32.mrf.mxu0  ;;  %v2807_v41 = vpop.f32.mrf.mxu1  ;;  %v2191_v31 = vadd.f32 %v5219_v25, %v5218_v62 }
 0x2a4   :  { %v2861_v14 = vadd.f32 %v2860_v63, %v2846_v48  ;;  %v2888_v9 = vmul.f32 %v2787_v3, %v4834_v15  ;;  %v2792_v46 = vadd.f32 %v2791_v2, %v2599_v1  ;;  %v2601_v8 = vadd.f32 %v2600_v20, %v4981_v40  ;;  %v5221_v48 = vld [vmem:[#allocation26_spill] sm:$0xff]  ;;  %v5223_v3 = vld [vmem:[#allocation28_spill] sm:$0xff] }
 0x2a5   :  { %v2605_v28 = vpop.f32.mrf.mxu0  ;;  %v2812_v49 = vpop.f32.mrf.mxu1 }
 0x2a6   :  { %v2903_v5 = vadd.f32 %v2902_v61, %v2888_v9  ;;  %v2847_v37 = vmul.f32 %v2792_v46, %v4829_v60  ;;  %v2794_v21 = vadd.f32 %v2793_v58, %v2601_v8  ;;  %v2606_v42 = vadd.f32 %v2605_v28, %v4984_v36  ;;  %v5225_v8 = vld [vmem:[#allocation15_spill] sm:$0xff] }
 0x2a7   :  { %v2607_v12 = vpop.f32.mrf.mxu0  ;;  %v2814_v47 = vpop.f32.mrf.mxu1 }
 0x2a8   :  { %v2862_v6 = vadd.f32 %v2861_v14, %v2847_v37  ;;  %v2889_v30 = vmul.f32 %v2794_v21, %v4829_v60  ;;  %v2799_v43 = vadd.f32 %v2798_v53, %v2606_v42  ;;  %v2608_v23 = vadd.f32 %v2607_v12, %v4987_v59  ;;  %v5224_v14 = vld [vmem:[#allocation22_spill] sm:$0xff]  ;;  %v5226_v21 = vld [vmem:[#allocation23_spill] sm:$0xff] }
 0x2a9   :  { %v2612_v15 = vpop.f32.mrf.mxu0  ;;  %v2819_v35 = vpop.f32.mrf.mxu1  ;;  %v2416_v42 = vadd.f32 %v5226_v21, %v2191_v31 }
 0x2aa   :  { %v2904_v57 = vadd.f32 %v2903_v5, %v2889_v30  ;;  %v2848_v40 = vmul.f32 %v2799_v43, %v4842_v34  ;;  %v2801_v2 = vadd.f32 %v2800_v56, %v2608_v23  ;;  %v2613_v7 = vadd.f32 %v2612_v15, %v4990_v13  ;;  %v5227_v15 = vld [vmem:[#allocation24_spill] sm:$0xff] }
 0x2ab   :  { %v2614_v50 = vpop.f32.mrf.mxu0  ;;  %v2821_v58 = vpop.f32.mrf.mxu1 }
 0x2ac   :  { %v2863_v38 = vadd.f32 %v2862_v6, %v2848_v40  ;;  %v2890_v36 = vmul.f32 %v2801_v2, %v4842_v34  ;;  %v2806_v52 = vadd.f32 %v2805_v17, %v2613_v7  ;;  %v2615_v55 = vadd.f32 %v2614_v50, %v4995_v45  ;;  %v5228_v40 = vld [vmem:[#allocation18_spill] sm:$0xff] }
 0x2ad   :  { %v2619_v60 = vpop.f32.mrf.mxu0  ;;  %v2185_v45 = vadd.f32 %v5016_v4, %v4916_v32  ;;  %v2826_v29 = vpop.f32.mrf.mxu1  ;;  %v5222_v4 = vld [vmem:[#allocation20_spill] sm:$0xff] }
 0x2ae   :  { %v2905_v39 = vadd.f32 %v2904_v57, %v2890_v36  ;;  %v2849_v59 = vmul.f32 %v2806_v52, %v4838_v10  ;;  %v2808_v11 = vadd.f32 %v2807_v41, %v2615_v55  ;;  %v2620_v54 = vadd.f32 %v2619_v60, %v5000_v22  ;;  %v5217_v22 = vld [vmem:[#allocation25_spill] sm:$0xff] }
 0x2af   :  { %v2621_v27 = vpop.f32.mrf.mxu0  ;;  %v2193_v1 = vadd.f32 %v5223_v3, %v5222_v4  ;;  %v2828_v20 = vpop.f32.mrf.mxu1  ;;  %v2409_v9 = vadd.f32 %v5224_v14, %v2185_v45 }
 0x2b0   :  { %v2864_v13 = vadd.f32 %v2863_v38, %v2849_v59  ;;  %v2891_v53 = vmul.f32 %v2808_v11, %v4838_v10  ;;  %v2813_v18 = vadd.f32 %v2812_v49, %v2620_v54  ;;  %v2622_v34 = vadd.f32 %v2621_v27, %v5005_v19  ;;  %v5229_v59 = vld [vmem:[#allocation17_spill] sm:$0xff] }
 0x2b1   :  { %v2626_v33 = vpop.f32.mrf.mxu0  ;;  %v2407_v10 = vadd.f32 %v5220_v26, %v2183_v51  ;;  %v2833_v43 = vpop.f32.mrf.mxu1 }
 0x2b2   :  { %v2906_v44 = vadd.f32 %v2905_v39, %v2891_v53  ;;  %v2850_v56 = vmul.f32 %v2813_v18, %v5216_v16  ;;  %v2815_v63 = vadd.f32 %v2814_v47, %v2622_v34  ;;  %v2627_v24 = vadd.f32 %v2626_v33, %v5217_v22 }
 0x2b3   :  { %v2628_v0 = vpop.f32.mrf.mxu0  ;;  %v2835_v60 = vpop.f32.mrf.mxu1 }
 0x2b4   :  { %v2865_v17 = vadd.f32 %v2864_v13, %v2850_v56  ;;  %v2892_v19 = vmul.f32 %v2815_v63, %v5216_v16  ;;  %v2820_v61 = vadd.f32 %v2819_v35, %v2627_v24  ;;  %v2629_v32 = vadd.f32 %v2628_v0, %v5221_v48 }
 0x2b5   :  { %v2633_v41 = vpop.f32.mrf.mxu0  ;;  %v2418_v35 = vadd.f32 %v5227_v15, %v2193_v1  ;;  %v5230_v63 = vlaneseq }
 0x2b6   :  { %v2907_v46 = vadd.f32 %v2906_v44, %v2892_v19  ;;  %v2851_v28 = vmul.f32 %v2820_v61, %v5225_v8  ;;  %v2822_v49 = vadd.f32 %v2821_v58, %v2629_v32  ;;  %v2634_v5 = vadd.f32 %v2633_v41, %v2407_v10 }
 0x2b7   :  { %v2635_v37 = vpop.f32.mrf.mxu0  ;;  %vm2877_vm7 = vcmp.lt.s32.totalorder %v5230_v63, 128 }
 0x2b8   :  { %v2866_v12 = vadd.f32 %v2865_v17, %v2851_v28  ;;  %v2893_v47 = vmul.f32 %v2822_v49, %v5225_v8  ;;  %v2827_v6 = vadd.f32 %v2826_v29, %v2634_v5  ;;  %v2636_v30 = vadd.f32 %v2635_v37, %v2409_v9 }
 0x2b9   :  { %v2640_v23 = vpop.f32.mrf.mxu0 }
 0x2ba   :  { %v2908_v57 = vadd.f32 %v2907_v46, %v2893_v47  ;;  %v2852_v2 = vmul.f32 %v2827_v6, %v5228_v40  ;;  %v2829_v7 = vadd.f32 %v2828_v20, %v2636_v30  ;;  %v2641_v50 = vadd.f32 %v2640_v23, %v2416_v42 }
 0x2bb   :  { %v2642_v38 = vpop.f32.mrf.mxu0 }
 0x2bc   :  { %v2867_v36 = vadd.f32 %v2866_v12, %v2852_v2  ;;  %v2894_v52 = vmul.f32 %v2829_v7, %v5228_v40  ;;  %v2834_v55 = vadd.f32 %v2833_v43, %v2641_v50  ;;  %v2643_v58 = vadd.f32 %v2642_v38, %v2418_v35 }
 0x2be   :  { %v2909_v39 = vadd.f32 %v2908_v57, %v2894_v52  ;;  %v2853_v11 = vmul.f32 %v2834_v55, %v5229_v59  ;;  %v2836_v54 = vadd.f32 %v2835_v60, %v2643_v58 }
 0x2c0   :  { %v2868_v51 = vadd.f32 %v2867_v36, %v2853_v11  ;;  %v2895_v27 = vmul.f32 %v2836_v54, %v5229_v59 }
 0x2c2   :  { %v2869_v13 = vrot.slane %v2868_v51, 4  ;;  %v2910_v53 = vadd.f32 %v2909_v39, %v2895_v27 }
 0x2c4   :  { %v2870_v18 = vadd.f32 %v2869_v13, %v2868_v51  ;;  %v2911_v34 = vrot.slane %v2910_v53, 4 }
 0x2c6   :  { %v2871_v45 = vrot.slane %v2870_v18, 2  ;;  %v2912_v29 = vadd.f32 %v2911_v34, %v2910_v53 }
 0x2c8   :  { %v2913_v33 = vrot.slane %v2912_v29, 2  ;;  %v2872_v44 = vadd.f32 %v2871_v45, %v2870_v18 }
 0x2ca   :  { %v2873_v16 = vrot.slane %v2872_v44, 1  ;;  %v2914_v56 = vadd.f32 %v2913_v33, %v2912_v29 }
 0x2cc   :  { %v2874_v22 = vadd.f32 %v2873_v16, %v2872_v44  ;;  %v2915_v24 = vrot.slane %v2914_v56, 1 }
 0x2ce   :  { %2879 = vst.msk [vmem:[#allocation10] sm:$0x1] %vm2877_vm7, %v2874_v22  ;;  %v2916_v62 = vadd.f32 %v2915_v24, %v2914_v56 }
 0x2d0   :  { %2917 = vst.msk [vmem:[#allocation10 + $0x1] sm:$0x1] %vm2877_vm7, %v2916_v62 }
 0x2d1   :  { %3428 = shalt.err (!%p3425_p10)
}
 0x2d2   :  { %2927 = dma.vmem_to_hbm [thread:$0]  %s2925_s3, 32, %s5102_s4, [#allocation4]  }
 0x2d3   :  { %3443 = dma.done.wait [#allocation4], 32  }
 0x2d4   :  { %3444 = vsyncadd [#allocation4], 4294967264 }
 0x2d5   :  { %2931 = vsyncpa [#allocation3], 1 }
 0x2d6   :  { %2932 = vsyncpa [#allocation6], 1 }
 0x2d7   :  { %2933 = vsyncpa [#allocation9], 1 }
 0x2d8   :  { %2934 = vsyncpa [#allocation4], 1 }

</bundles_post_ra>
